<compile_context>
chip_gen: v7x
topology: tpu7x:2x2x1
jax: 0.10.0
libtpu: 0.0.40
codegen_flags: <defaults>
</compile_context>

<pallas_src>
import functools

import jax
import jax.numpy as jnp
from jax import lax
from jax.experimental import pallas as pl
from jax.experimental.pallas import tpu as pltpu

LANE = 128              # channel / K axes padded to the TPU lane width
EPS = 1e-5              # PyTorch BatchNorm2d default
USE_BF16_MATMUL = True  # bf16 MXU inputs + bf16 inter-layer activations, f32 accumulation


def _round_up(x, m):
    return (x + m - 1) // m * m


@functools.lru_cache(maxsize=None)
def _vmem_budgets():
    """(vmem_limit_bytes, per-step tile budget) — generation aware (v7x: 64 MiB/TC)."""
    cap = 64 * 1024 * 1024
    try:
        info = pltpu.get_tpu_info()
        cap = int(getattr(info, "vmem_capacity_bytes", cap))
    except Exception:
        pass
    vmem_limit = min(cap * 3 // 4, 100 * 1024 * 1024)   # v5e/v6e ~96 MiB, v7x ~48 MiB
    tile_budget = min(cap // 4, 32 * 1024 * 1024)       # v5e/v6e ~32 MiB, v7x ~16 MiB
    return int(vmem_limit), int(tile_budget)


def _pick_row_tile(H, W, cin_p, cout_p, act_bytes, budget):
    """Largest divisor Th of H whose per-step VMEM footprint fits the budget, preferring
    Th*W a multiple of 256 so the 256-wide v6e/v7x MXU is filled."""
    def footprint(th):
        xpad = (th + 2) * (W + 2) * cin_p * 4                 # f32 padded-tile scratch
        col = th * W * 9 * cin_p * act_bytes                  # im2col scratch (act dtype)
        body = 2 * th * W * cin_p * act_bytes                 # double-buffered body tile
        halo = 2 * 2 * W * cin_p * act_bytes                  # double-buffered halo rows
        out = 2 * th * W * cout_p * act_bytes                 # double-buffered output tile
        stats = 2 * 2 * cout_p * 4                            # double-buffered stats tile
        wgt = 9 * cin_p * cout_p * act_bytes                  # resident weights
        vecs = 2 * 2 * cin_p * 4                              # scale / shift
        return xpad + col + body + halo + out + stats + wgt + vecs

    cands = [th for th in range(1, H + 1) if H % th == 0 and footprint(th) <= budget]
    if not cands:
        raise ValueError(
            "conv tile does not fit the per-step VMEM budget even at Th=1; "
            "this layer needs Cout tiling (extra grid axis).")
    pref = [th for th in cands if (th * W) % 256 == 0]
    return max(pref) if pref else max(cands)


# --------------------------------------------------------------------------------------
# Kernel 1: fused [prev-layer folded BN scale/shift + ReLU] -> 'same' pad -> 3x3 conv
#           (one deep-K MXU matmul) -> per-tile BatchNorm partial statistics.
# --------------------------------------------------------------------------------------
def _conv_stats_kernel(body_ref, top_ref, bot_ref, w_ref, scale_ref, shift_ref,
                       o_ref, stats_ref, xpad_ref, col_ref, *, Th, W, apply_act):
    """
    body_ref : (1, Th, W, Cin)  tile rows of the previous layer's raw conv output (act dtype)
    top_ref  : (1, 1, W, Cin)   row above the tile (clamped index; zeroed at h == 0)
    bot_ref  : (1, 1, W, Cin)   row below the tile (clamped index; zeroed at h == nh-1)
    w_ref    : (9*Cin, Cout)    conv weights, tap-major rows ((ky*3+kx)*Cin + ci), act dtype
    scale_ref, shift_ref : (1, Cin)  previous layer's folded BN scale/shift (f32)
    o_ref    : (1, Th, W, Cout) raw (pre-BN) conv output of this layer (act dtype)
    stats_ref: (1, 1, 2, Cout)  per-tile [sum, sum-of-squares] over Th*W positions (f32)
    xpad_ref : (Th+2, W+2, Cin) f32 scratch: zero-padded post-activation tile
    col_ref  : (Th, W, 9*Cin)   act-dtype scratch: im2col operand (cast fused into copy)
    """
    h = pl.program_id(1)
    nh = pl.num_programs(1)
    Cin = body_ref.shape[-1]
    Cout = o_ref.shape[-1]

    if apply_act:
        scale = scale_ref[0]                       # (Cin,) f32
        shift = shift_ref[0]
        act = lambda v: jnp.maximum(v.astype(jnp.float32) * scale + shift, 0.0)
    else:                                          # raw (already channel-padded) input
        act = lambda v: v.astype(jnp.float32)

    # 'same' zero padding ring: only the left/right columns (incl. corners) need active
    # zeroing — everything else is fully overwritten below, so no full-scratch zero pass.
    zcol = jnp.zeros((Th + 2, 1, Cin), jnp.float32)
    xpad_ref[:, 0:1, :] = zcol
    xpad_ref[:, W + 1:W + 2, :] = zcol

    xpad_ref[1:Th + 1, 1:W + 1, :] = act(body_ref[0])          # body rows

    # Halo rows: image data inside the tensor, zeros at the image boundary. The scratch
    # persists across grid steps (and per-core on megacore), so the boundary branch must
    # actively write zeros rather than rely on stale contents.
    @pl.when(h > 0)
    def _():
        xpad_ref[0:1, 1:W + 1, :] = act(top_ref[0])

    @pl.when(h == 0)
    def _():
        xpad_ref[0:1, 1:W + 1, :] = jnp.zeros((1, W, Cin), jnp.float32)

    @pl.when(h < nh - 1)
    def _():
        xpad_ref[Th + 1:Th + 2, 1:W + 1, :] = act(bot_ref[0])

    @pl.when(h == nh - 1)
    def _():
        xpad_ref[Th + 1:Th + 2, 1:W + 1, :] = jnp.zeros((1, W, Cin), jnp.float32)

    # im2col (f32 -> act-dtype cast fused into the copy) then ONE deep-K MXU matmul.
    # TODO(synk): the kx=1/2 sublane-shifted reads could be moved to the XLU with
    #             pltpu.roll if the vld/vst slots ever become the binding unit.
    for t in range(9):
        ky, kx = divmod(t, 3)
        col_ref[:, :, t * Cin:(t + 1) * Cin] = (
            xpad_ref[ky:ky + Th, kx:kx + W, :].astype(col_ref.dtype))

    y = jnp.dot(col_ref[...].reshape(Th * W, 9 * Cin), w_ref[...],
                preferred_element_type=jnp.float32)            # (Th*W, Cout) f32

    # Per-tile partial BatchNorm statistics from the f32 MXU result (before any cast).
    s1 = jnp.sum(y, axis=0, keepdims=True)
    s2 = jnp.sum(y * y, axis=0, keepdims=True)
    stats_ref[...] = jnp.concatenate([s1, s2], axis=0).reshape(1, 1, 2, Cout)

    o_ref[...] = y.reshape(1, Th, W, Cout).astype(o_ref.dtype)


def _conv_layer(a_prev, w9, scale_in, shift_in, *, apply_act, row_tile, act_dtype,
                vmem_limit):
    N, H, W, Cin_p = a_prev.shape
    Cout_p = w9.shape[1]
    Th = row_tile
    nh = H // Th

    kern = functools.partial(_conv_stats_kernel, Th=Th, W=W, apply_act=apply_act)

    body_spec = pl.BlockSpec((1, Th, W, Cin_p), lambda n, h: (n, h, 0, 0))
    top_spec = pl.BlockSpec((1, 1, W, Cin_p),
                            lambda n, h: (n, jnp.maximum(h * Th - 1, 0), 0, 0))
    bot_spec = pl.BlockSpec((1, 1, W, Cin_p),
                            lambda n, h: (n, jnp.minimum((h + 1) * Th, H - 1), 0, 0))
    w_spec = pl.BlockSpec((9 * Cin_p, Cout_p), lambda n, h: (0, 0))
    vec_spec = pl.BlockSpec((1, Cin_p), lambda n, h: (0, 0))

    return pl.pallas_call(
        kern,
        grid=(N, nh),
        in_specs=[body_spec, top_spec, bot_spec, w_spec, vec_spec, vec_spec],
        out_specs=(pl.BlockSpec((1, Th, W, Cout_p), lambda n, h: (n, h, 0, 0)),
                   pl.BlockSpec((1, 1, 2, Cout_p), lambda n, h: (n, h, 0, 0))),
        out_shape=(jax.ShapeDtypeStruct((N, H, W, Cout_p), act_dtype),
                   jax.ShapeDtypeStruct((N, nh, 2, Cout_p), jnp.float32)),
        scratch_shapes=[pltpu.VMEM((Th + 2, W + 2, Cin_p), jnp.float32),
                        pltpu.VMEM((Th, W, 9 * Cin_p), act_dtype)],
        compiler_params=pltpu.CompilerParams(
            dimension_semantics=("parallel", "parallel"),
            vmem_limit_bytes=vmem_limit),
    )(a_prev, a_prev, a_prev, w9, scale_in, shift_in)


# --------------------------------------------------------------------------------------
# Kernel 2: dense matmul + BN statistics (small-Cin first layer, K = round_up(9*Cin,128)).
# --------------------------------------------------------------------------------------
def _matmul_stats_kernel(x_ref, w_ref, o_ref, stats_ref, *, Th, W):
    """x_ref: (1, Th, W, Kp) pre-im2col'ed input tile; w_ref: (Kp, Cout)."""
    Kp = x_ref.shape[-1]
    Cout = o_ref.shape[-1]
    y = jnp.dot(x_ref[...].reshape(Th * W, Kp), w_ref[...],
                preferred_element_type=jnp.float32)
    s1 = jnp.sum(y, axis=0, keepdims=True)
    s2 = jnp.sum(y * y, axis=0, keepdims=True)
    stats_ref[...] = jnp.concatenate([s1, s2], axis=0).reshape(1, 1, 2, Cout)
    o_ref[...] = y.reshape(1, Th, W, Cout).astype(o_ref.dtype)


def _matmul_stats_layer(xcol, w0, *, row_tile, act_dtype, vmem_limit):
    N, H, W, Kp = xcol.shape
    Cout_p = w0.shape[1]
    Th = row_tile
    nh = H // Th
    kern = functools.partial(_matmul_stats_kernel, Th=Th, W=W)
    return pl.pallas_call(
        kern,
        grid=(N, nh),
        in_specs=[pl.BlockSpec((1, Th, W, Kp), lambda n, h: (n, h, 0, 0)),
                  pl.BlockSpec((Kp, Cout_p), lambda n, h: (0, 0))],
        out_specs=(pl.BlockSpec((1, Th, W, Cout_p), lambda n, h: (n, h, 0, 0)),
                   pl.BlockSpec((1, 1, 2, Cout_p), lambda n, h: (n, h, 0, 0))),
        out_shape=(jax.ShapeDtypeStruct((N, H, W, Cout_p), act_dtype),
                   jax.ShapeDtypeStruct((N, nh, 2, Cout_p), jnp.float32)),
        compiler_params=pltpu.CompilerParams(
            dimension_semantics=("parallel", "parallel"),
            vmem_limit_bytes=vmem_limit),
    )(xcol, w0)


# --------------------------------------------------------------------------------------
# Kernel 3: final per-channel scale/shift + ReLU (last layer's BatchNorm + activation).
# --------------------------------------------------------------------------------------
def _affine_relu_kernel(x_ref, scale_ref, shift_ref, o_ref):
    y = x_ref[...].astype(jnp.float32) * scale_ref[0] + shift_ref[0]
    o_ref[...] = jnp.maximum(y, 0.0).astype(o_ref.dtype)


def _affine_relu(x, scale, shift, *, row_tile, vmem_limit):
    N, H, W, C = x.shape
    Th = row_tile
    nh = H // Th
    return pl.pallas_call(
        _affine_relu_kernel,
        grid=(N, nh),
        in_specs=[pl.BlockSpec((1, Th, W, C), lambda n, h: (n, h, 0, 0)),
                  pl.BlockSpec((1, C), lambda n, h: (0, 0)),
                  pl.BlockSpec((1, C), lambda n, h: (0, 0))],
        out_specs=pl.BlockSpec((1, Th, W, C), lambda n, h: (n, h, 0, 0)),
        out_shape=jax.ShapeDtypeStruct((N, H, W, C), jnp.float32),
        compiler_params=pltpu.CompilerParams(
            dimension_semantics=("parallel", "parallel"),
            vmem_limit_bytes=vmem_limit),
    )(x, scale, shift)


# --------------------------------------------------------------------------------------
# Wrapper-side helpers.
# --------------------------------------------------------------------------------------
def _bn_scale_shift(stats, count, gamma_p, beta_p, eps=EPS):
    """Fold training-mode BatchNorm batch stats + affine into one per-channel scale/shift."""
    # TODO(synk): the one-pass E[y^2]-mean^2 form can lose precision for very large
    #             N*H*W; switch to a shifted / Welford-style combine if tighter accuracy
    #             is ever required.
    s = jnp.sum(stats, axis=(0, 1))                      # (2, Cp): [sum, sumsq]
    mean = s[0] / count
    var = jnp.maximum(s[1] / count - mean * mean, 0.0)   # biased variance (training BN)
    scale = gamma_p * lax.rsqrt(var + eps)
    shift = beta_p - mean * scale
    return scale[None, :], shift[None, :]


def _im2col_nhwc(x):
    """(N,H,W,C) -> (N,H,W,9*C); 'same' zero padding; tap-major (ky*3+kx) then channel."""
    N, H, W, C = x.shape
    xp = jnp.pad(x, ((0, 0), (1, 1), (1, 1), (0, 0)))
    cols = [xp[:, ky:ky + H, kx:kx + W, :] for ky in range(3) for kx in range(3)]
    return jnp.concatenate(cols, axis=-1)


def init_conv_block_params(key, in_dim, out_dim, nconv):
    """Deterministic synthetic parameters for nconv conv/bn layers (weights in HWIO)."""
    feature = [in_dim] + [out_dim] * nconv
    params = []
    for i in range(nconv):
        cin, cout = feature[i], feature[i + 1]
        key, kw, kb, kg, kbt = jax.random.split(key, 5)
        w = jax.random.normal(kw, (3, 3, cin, cout), jnp.float32) * 0.1
        b = jax.random.normal(kb, (cout,), jnp.float32) * 0.1
        gamma = 1.0 + 0.1 * jax.random.normal(kg, (cout,), jnp.float32)
        beta = 0.1 * jax.random.normal(kbt, (cout,), jnp.float32)
        params.append((w, b, gamma, beta))
    return params


def conv_block_forward(x_nchw, params, *, row_tile=None, use_bf16=USE_BF16_MATMUL):
    """ConvBlock.forward (pool=False): [Conv2d(3x3, pad=1) -> BatchNorm2d(train) -> ReLU]*n.

    The Conv2d bias is dropped inside the kernels: training-mode BatchNorm's mean
    subtraction cancels a per-channel bias exactly, so the result matches the PyTorch
    reference.
    """
    N, Cin, H, W = x_nchw.shape
    act_dtype = jnp.bfloat16 if use_bf16 else jnp.float32
    act_bytes = 2 if use_bf16 else 4
    vmem_limit, tile_budget = _vmem_budgets()

    x_nhwc = jnp.transpose(x_nchw, (0, 2, 3, 1))                     # NCHW -> NHWC
    cout_last = params[-1][0].shape[3]

    if row_tile is None:
        widths = [params[0][0].shape[2]] + [p[0].shape[3] for p in params]
        cmax = max(_round_up(c, LANE) for c in widths)
        row_tile = _pick_row_tile(H, W, cmax, cmax, act_bytes, tile_budget)
    assert H % row_tile == 0, (H, row_tile)

    count = float(N * H * W)
    a = None
    scale = shift = None

    for li, (w, _b, gamma, beta) in enumerate(params):   # _b unused: cancelled by BN
        ci, co = w.shape[2], w.shape[3]
        ci_p, co_p = _round_up(ci, LANE), _round_up(co, LANE)
        gamma_p = jnp.pad(gamma, (0, co_p - co), constant_values=1.0)
        beta_p = jnp.pad(beta, (0, co_p - co))

        if li == 0 and ci < LANE:
            # Small-Cin first layer: joint K packing round_up(9*Cin, 128) (not
            # 9*round_up(Cin, 128)); the 'same'-padded im2col of the tiny raw input is
            # built once in XLA and the layer becomes a dense matmul + BN-stats kernel.
            k_real = 9 * ci
            k_p = _round_up(k_real, LANE)
            xcol = _im2col_nhwc(x_nhwc)                              # (N,H,W,9*Cin) f32
            xcol = jnp.pad(xcol, ((0, 0), (0, 0), (0, 0), (0, k_p - k_real)))
            xcol = xcol.astype(act_dtype)
            w0 = jnp.pad(w.reshape(k_real, co),
                         ((0, k_p - k_real), (0, co_p - co))).astype(act_dtype)
            conv_raw, stats = _matmul_stats_layer(
                xcol, w0, row_tile=row_tile, act_dtype=act_dtype, vmem_limit=vmem_limit)
        else:
            wp = jnp.pad(w, ((0, 0), (0, 0), (0, ci_p - ci), (0, co_p - co)))
            w9 = wp.reshape(9 * ci_p, co_p).astype(act_dtype)        # pre-cast, resident
            if li == 0:
                a = jnp.pad(x_nhwc, ((0, 0), (0, 0), (0, 0), (0, ci_p - ci)))
                a = a.astype(act_dtype)
                scale = jnp.ones((1, ci_p), jnp.float32)             # identity (unused)
                shift = jnp.zeros((1, ci_p), jnp.float32)
                apply_act = False
            else:
                apply_act = True
            conv_raw, stats = _conv_layer(
                a, w9, scale, shift, apply_act=apply_act, row_tile=row_tile,
                act_dtype=act_dtype, vmem_limit=vmem_limit)

        scale, shift = _bn_scale_shift(stats, count, gamma_p, beta_p)
        a = conv_raw

    y = _affine_relu(a, scale, shift, row_tile=row_tile, vmem_limit=vmem_limit)
    y = y[..., :cout_last]                                # drop channel padding
    return jnp.transpose(y, (0, 3, 1, 2))                 # NHWC -> NCHW


def conv_block_reference(x_nchw, params, eps=EPS):
    """Plain-JAX reference: Conv2d(3x3, pad=1, bias) -> BatchNorm2d(training) -> ReLU."""
    x = x_nchw
    for (w_hwio, b, gamma, beta) in params:
        w_oihw = jnp.transpose(w_hwio, (3, 2, 0, 1))
        y = lax.conv_general_dilated(
            x, w_oihw, window_strides=(1, 1), padding=((1, 1), (1, 1)),
            dimension_numbers=("NCHW", "OIHW", "NCHW"))
        y = y + b[None, :, None, None]
        mean = jnp.mean(y, axis=(0, 2, 3), keepdims=True)
        var = jnp.mean(jnp.square(y - mean), axis=(0, 2, 3), keepdims=True)
        y = (y - mean) * lax.rsqrt(var + eps)
        y = y * gamma[None, :, None, None] + beta[None, :, None, None]
        x = jnp.maximum(y, 0.0)
    return x


if __name__ == "__main__":
    key = jax.random.PRNGKey(0)
    k_x, k_p = jax.random.split(key)

    in_dim, out_dim, nconv = 4, 8, 2
    N, H, W = 2, 16, 16
    x = jax.random.normal(k_x, (N, in_dim, H, W), jnp.float32)       # NCHW, like PyTorch
    params = init_conv_block_params(k_p, in_dim, out_dim, nconv)

    y_ref = conv_block_reference(x, params)

    # row_tile=8 -> grid (N=2, nh=2): exercises halo tiles, boundary zeroing and the
    # cross-tile BatchNorm statistics reduction (auto-picker would choose Th*W % 256 == 0).

    # 1) f32-exact path: tight structural check against the PyTorch-equivalent reference.
    fwd_f32 = jax.jit(functools.partial(conv_block_forward, row_tile=8, use_bf16=False))
    y32 = jax.block_until_ready(fwd_f32(x, params))
    err32 = float(jnp.max(jnp.abs(y32 - y_ref)))
    assert err32 < 1e-3, err32

    # 2) default fast path: bf16 MXU inputs + bf16 inter-layer activations, f32 accumulation.
    fwd = jax.jit(functools.partial(conv_block_forward, row_tile=8))
    y = jax.block_until_ready(fwd(x, params))

    assert y.shape == (N, out_dim, H, W), y.shape
    assert bool(jnp.all(jnp.isfinite(y)))
    assert bool(jnp.all(y >= 0.0))                                   # ReLU output
    err = float(jnp.max(jnp.abs(y - y_ref)))
    assert err < 1e-1, err                                           # bf16-appropriate tol

    print("KERNEL_OK")
</pallas_src>

<mosaic_0001>
module attributes {stable_mosaic.version = 11 : i64} {
  func.func @_matmul_stats_kernel(%arg0: i32, %arg1: i32, %arg2: memref<1x8x16x128xf32, #tpu.memory_space<vmem>>, %arg3: memref<128x128xf32, #tpu.memory_space<vmem>>, %arg4: memref<1x8x16x128xf32, #tpu.memory_space<vmem>>, %arg5: memref<1x1x2x128xf32, #tpu.memory_space<vmem>>) attributes {dimension_semantics = [#tpu.dimension_semantics<parallel>, #tpu.dimension_semantics<parallel>], iteration_bounds = array<i64: 2, 2>, scalar_prefetch = 0 : i64, scratch_operands = 0 : i64, tpu.core_type = #tpu.core_type<tc>, window_params = [{transform_indices = @transform_0, window_bounds = array<i64: 1, 8, 16, 128>}, {pipeline_mode = #tpu.pipeline_mode<synchronous>, transform_indices = @transform_1, window_bounds = array<i64: 128, 128>}, {transform_indices = @transform_2, window_bounds = array<i64: 1, 8, 16, 128>}, {transform_indices = @transform_3, window_bounds = array<i64: 1, 1, 2, 128>}]} {
    %c0 = arith.constant 0 : index
    %c0_0 = arith.constant 0 : index
    %c0_1 = arith.constant 0 : index
    %c0_2 = arith.constant 0 : index
    %0 = vector.load %arg2[%c0, %c0_0, %c0_1, %c0_2] : memref<1x8x16x128xf32, #tpu.memory_space<vmem>>, vector<1x8x16x128xf32>
    %1 = vector.shape_cast %0 : vector<1x8x16x128xf32> to vector<128x128xf32>
    %c0_3 = arith.constant 0 : index
    %c0_4 = arith.constant 0 : index
    %2 = vector.load %arg3[%c0_3, %c0_4] : memref<128x128xf32, #tpu.memory_space<vmem>>, vector<128x128xf32>
    %cst = arith.constant dense<0.000000e+00> : vector<128x128xf32>
    %3 = tpu.matmul %1, %2, %cst {dimension_numbers = #tpu.dot_dimension_numbers<[1], [0], [0], [1], [0, 0, 1, 1], [], []>} : vector<128x128xf32>, vector<128x128xf32>, vector<128x128xf32> -> vector<128x128xf32>
    %cst_5 = arith.constant dense<0.000000e+00> : vector<128xf32>
    %4 = vector.multi_reduction <add>, %3, %cst_5 [0] : vector<128x128xf32> to vector<128xf32>
    %5 = vector.shape_cast %4 : vector<128xf32> to vector<1x128xf32>
    %6 = arith.mulf %3, %3 : vector<128x128xf32>
    %cst_6 = arith.constant dense<0.000000e+00> : vector<128xf32>
    %7 = vector.multi_reduction <add>, %6, %cst_6 [0] : vector<128x128xf32> to vector<128xf32>
    %8 = vector.shape_cast %7 : vector<128xf32> to vector<1x128xf32>
    %9 = tpu.concatenate %5, %8 in 0 : vector<1x128xf32>, vector<1x128xf32> -> vector<2x128xf32>
    %10 = vector.shape_cast %9 : vector<2x128xf32> to vector<1x1x2x128xf32>
    %c0_7 = arith.constant 0 : index
    %c0_8 = arith.constant 0 : index
    %c0_9 = arith.constant 0 : index
    %c0_10 = arith.constant 0 : index
    %11 = vector.load %arg5[%c0_7, %c0_8, %c0_9, %c0_10] : memref<1x1x2x128xf32, #tpu.memory_space<vmem>>, vector<1x1x2x128xf32>
    tpu.vector_store %arg5[%c0_7, %c0_8, %c0_9, %c0_10], %10 {strides = array<i32>} : memref<1x1x2x128xf32, #tpu.memory_space<vmem>>, vector<1x1x2x128xf32>,
    %12 = vector.shape_cast %3 : vector<128x128xf32> to vector<1x8x16x128xf32>
    %c0_11 = arith.constant 0 : index
    %c0_12 = arith.constant 0 : index
    %c0_13 = arith.constant 0 : index
    %c0_14 = arith.constant 0 : index
    %13 = vector.load %arg4[%c0_11, %c0_12, %c0_13, %c0_14] : memref<1x8x16x128xf32, #tpu.memory_space<vmem>>, vector<1x8x16x128xf32>
    tpu.vector_store %arg4[%c0_11, %c0_12, %c0_13, %c0_14], %12 {strides = array<i32>} : memref<1x8x16x128xf32, #tpu.memory_space<vmem>>, vector<1x8x16x128xf32>,
    return
  }
  func.func @transform_0(%arg0: i32, %arg1: i32) -> (i32, i32, i32, i32) {
    %c0_i32 = arith.constant 0 : i32
    %c0_i32_0 = arith.constant 0 : i32
    %c0_i32_1 = arith.constant 0 : i32
    return %arg0, %arg1, %c0_i32, %c0_i32_0 : i32, i32, i32, i32
  }
  func.func @transform_1(%arg0: i32, %arg1: i32) -> (i32, i32) {
    %c0_i32 = arith.constant 0 : i32
    %c0_i32_0 = arith.constant 0 : i32
    %c0_i32_1 = arith.constant 0 : i32
    return %c0_i32, %c0_i32_0 : i32, i32
  }
  func.func @transform_2(%arg0: i32, %arg1: i32) -> (i32, i32, i32, i32) {
    %c0_i32 = arith.constant 0 : i32
    %c0_i32_0 = arith.constant 0 : i32
    %c0_i32_1 = arith.constant 0 : i32
    return %arg0, %arg1, %c0_i32, %c0_i32_0 : i32, i32, i32, i32
  }
  func.func @transform_3(%arg0: i32, %arg1: i32) -> (i32, i32, i32, i32) {
    %c0_i32 = arith.constant 0 : i32
    %c0_i32_0 = arith.constant 0 : i32
    %c0_i32_1 = arith.constant 0 : i32
    return %arg0, %arg1, %c0_i32, %c0_i32_0 : i32, i32, i32, i32
  }
}

module attributes {stable_mosaic.version = 11 : i64} {
  func.func @_conv_stats_kernel(%arg0: i32, %arg1: i32, %arg2: memref<1x8x16x128xf32, #tpu.memory_space<vmem>>, %arg3: memref<1x1x16x128xf32, #tpu.memory_space<vmem>>, %arg4: memref<1x1x16x128xf32, #tpu.memory_space<vmem>>, %arg5: memref<1152x128xf32, #tpu.memory_space<vmem>>, %arg6: memref<1x128xf32, #tpu.memory_space<vmem>>, %arg7: memref<1x128xf32, #tpu.memory_space<vmem>>, %arg8: memref<1x8x16x128xf32, #tpu.memory_space<vmem>>, %arg9: memref<1x1x2x128xf32, #tpu.memory_space<vmem>>, %arg10: memref<10x18x128xf32, #tpu.memory_space<vmem>>, %arg11: memref<8x16x1152xf32, #tpu.memory_space<vmem>>) attributes {dimension_semantics = [#tpu.dimension_semantics<parallel>, #tpu.dimension_semantics<parallel>], iteration_bounds = array<i64: 2, 2>, scalar_prefetch = 0 : i64, scratch_operands = 2 : i64, tpu.core_type = #tpu.core_type<tc>, window_params = [{transform_indices = @transform_0, window_bounds = array<i64: 1, 8, 16, 128>}, {transform_indices = @transform_1, window_bounds = array<i64: 1, 1, 16, 128>}, {transform_indices = @transform_2, window_bounds = array<i64: 1, 1, 16, 128>}, {pipeline_mode = #tpu.pipeline_mode<synchronous>, transform_indices = @transform_3, window_bounds = array<i64: 1152, 128>}, {pipeline_mode = #tpu.pipeline_mode<synchronous>, transform_indices = @transform_4, window_bounds = array<i64: 1, 128>}, {pipeline_mode = #tpu.pipeline_mode<synchronous>, transform_indices = @transform_5, window_bounds = array<i64: 1, 128>}, {transform_indices = @transform_6, window_bounds = array<i64: 1, 8, 16, 128>}, {transform_indices = @transform_7, window_bounds = array<i64: 1, 1, 2, 128>}]} {
    %c0 = arith.constant 0 : index
    %c0_0 = arith.constant 0 : index
    %0 = vector.load %arg6[%c0, %c0_0] : memref<1x128xf32, #tpu.memory_space<vmem>>, vector<1x128xf32>
    %1 = vector.shape_cast %0 : vector<1x128xf32> to vector<128xf32>
    %c0_1 = arith.constant 0 : index
    %c0_2 = arith.constant 0 : index
    %2 = vector.load %arg7[%c0_1, %c0_2] : memref<1x128xf32, #tpu.memory_space<vmem>>, vector<1x128xf32>
    %3 = vector.shape_cast %2 : vector<1x128xf32> to vector<128xf32>
    %cst = arith.constant 0.000000e+00 : f32
    %4 = vector.broadcast %cst : f32 to vector<10x1x128xf32>
    %c0_3 = arith.constant 0 : index
    %c0_4 = arith.constant 0 : index
    %c0_5 = arith.constant 0 : index
    %5 = vector.load %arg10[%c0_3, %c0_4, %c0_5] : memref<10x18x128xf32, #tpu.memory_space<vmem>>, vector<10x1x128xf32>
    tpu.vector_store %arg10[%c0_3, %c0_4, %c0_5], %4 {strides = array<i32>} : memref<10x18x128xf32, #tpu.memory_space<vmem>>, vector<10x1x128xf32>,
    %c0_6 = arith.constant 0 : index
    %c17 = arith.constant 17 : index
    %c0_7 = arith.constant 0 : index
    %6 = vector.load %arg10[%c0_6, %c17, %c0_7] : memref<10x18x128xf32, #tpu.memory_space<vmem>>, vector<10x1x128xf32>
    tpu.vector_store %arg10[%c0_6, %c17, %c0_7], %4 {strides = array<i32>} : memref<10x18x128xf32, #tpu.memory_space<vmem>>, vector<10x1x128xf32>,
    %c0_8 = arith.constant 0 : index
    %c0_9 = arith.constant 0 : index
    %c0_10 = arith.constant 0 : index
    %c0_11 = arith.constant 0 : index
    %7 = vector.load %arg2[%c0_8, %c0_9, %c0_10, %c0_11] : memref<1x8x16x128xf32, #tpu.memory_space<vmem>>, vector<1x8x16x128xf32>
    %8 = vector.shape_cast %7 : vector<1x8x16x128xf32> to vector<8x16x128xf32>
    %9 = vector.shape_cast %1 : vector<128xf32> to vector<1x1x128xf32>
    %10 = vector.broadcast %9 : vector<1x1x128xf32> to vector<8x16x128xf32>
    %11 = arith.mulf %8, %10 : vector<8x16x128xf32>
    %12 = vector.shape_cast %3 : vector<128xf32> to vector<1x1x128xf32>
    %13 = vector.broadcast %12 : vector<1x1x128xf32> to vector<8x16x128xf32>
    %14 = arith.addf %11, %13 : vector<8x16x128xf32>
    %cst_12 = arith.constant 0.000000e+00 : f32
    %15 = vector.broadcast %cst_12 : f32 to vector<8x16x128xf32>
    %16 = arith.maximumf %14, %15 : vector<8x16x128xf32>
    %c1 = arith.constant 1 : index
    %c1_13 = arith.constant 1 : index
    %c0_14 = arith.constant 0 : index
    %17 = vector.load %arg10[%c1, %c1_13, %c0_14] : memref<10x18x128xf32, #tpu.memory_space<vmem>>, vector<8x16x128xf32>
    tpu.vector_store %arg10[%c1, %c1_13, %c0_14], %16 {strides = array<i32>} : memref<10x18x128xf32, #tpu.memory_space<vmem>>, vector<8x16x128xf32>,
    %c0_i32 = arith.constant 0 : i32
    %18 = arith.cmpi sgt, %arg1, %c0_i32 : i32
    %19 = arith.extui %18 : i1 to i32
    %c0_i32_15 = arith.constant 0 : i32
    %20 = arith.cmpi ne, %19, %c0_i32_15 : i32
    scf.if %20 {
      %c0_82 = arith.constant 0 : index
      %c0_83 = arith.constant 0 : index
      %c0_84 = arith.constant 0 : index
      %c0_85 = arith.constant 0 : index
      %62 = vector.load %arg3[%c0_82, %c0_83, %c0_84, %c0_85] : memref<1x1x16x128xf32, #tpu.memory_space<vmem>>, vector<1x1x16x128xf32>
      %63 = vector.shape_cast %62 : vector<1x1x16x128xf32> to vector<1x16x128xf32>
      %64 = vector.shape_cast %1 : vector<128xf32> to vector<1x1x128xf32>
      %65 = vector.broadcast %64 : vector<1x1x128xf32> to vector<1x16x128xf32>
      %66 = arith.mulf %63, %65 : vector<1x16x128xf32>
      %67 = vector.shape_cast %3 : vector<128xf32> to vector<1x1x128xf32>
      %68 = vector.broadcast %67 : vector<1x1x128xf32> to vector<1x16x128xf32>
      %69 = arith.addf %66, %68 : vector<1x16x128xf32>
      %cst_86 = arith.constant 0.000000e+00 : f32
      %70 = vector.broadcast %cst_86 : f32 to vector<1x16x128xf32>
      %71 = arith.maximumf %69, %70 : vector<1x16x128xf32>
      %c0_87 = arith.constant 0 : index
      %c1_88 = arith.constant 1 : index
      %c0_89 = arith.constant 0 : index
      %72 = vector.load %arg10[%c0_87, %c1_88, %c0_89] : memref<10x18x128xf32, #tpu.memory_space<vmem>>, vector<1x16x128xf32>
      tpu.vector_store %arg10[%c0_87, %c1_88, %c0_89], %71 {strides = array<i32>} : memref<10x18x128xf32, #tpu.memory_space<vmem>>, vector<1x16x128xf32>,
    } else {
    }
    %c0_i32_16 = arith.constant 0 : i32
    %21 = arith.cmpi eq, %arg1, %c0_i32_16 : i32
    %22 = arith.extui %21 : i1 to i32
    %c0_i32_17 = arith.constant 0 : i32
    %23 = arith.cmpi ne, %22, %c0_i32_17 : i32
    scf.if %23 {
      %cst_82 = arith.constant 0.000000e+00 : f32
      %62 = vector.broadcast %cst_82 : f32 to vector<1x16x128xf32>
      %c0_83 = arith.constant 0 : index
      %c1_84 = arith.constant 1 : index
      %c0_85 = arith.constant 0 : index
      %63 = vector.load %arg10[%c0_83, %c1_84, %c0_85] : memref<10x18x128xf32, #tpu.memory_space<vmem>>, vector<1x16x128xf32>
      tpu.vector_store %arg10[%c0_83, %c1_84, %c0_85], %62 {strides = array<i32>} : memref<10x18x128xf32, #tpu.memory_space<vmem>>, vector<1x16x128xf32>,
    } else {
    }
    %c1_i32 = arith.constant 1 : i32
    %24 = arith.cmpi slt, %arg1, %c1_i32 : i32
    %25 = arith.extui %24 : i1 to i32
    %c0_i32_18 = arith.constant 0 : i32
    %26 = arith.cmpi ne, %25, %c0_i32_18 : i32
    scf.if %26 {
      %c0_82 = arith.constant 0 : index
      %c0_83 = arith.constant 0 : index
      %c0_84 = arith.constant 0 : index
      %c0_85 = arith.constant 0 : index
      %62 = vector.load %arg4[%c0_82, %c0_83, %c0_84, %c0_85] : memref<1x1x16x128xf32, #tpu.memory_space<vmem>>, vector<1x1x16x128xf32>
      %63 = vector.shape_cast %62 : vector<1x1x16x128xf32> to vector<1x16x128xf32>
      %64 = vector.shape_cast %1 : vector<128xf32> to vector<1x1x128xf32>
      %65 = vector.broadcast %64 : vector<1x1x128xf32> to vector<1x16x128xf32>
      %66 = arith.mulf %63, %65 : vector<1x16x128xf32>
      %67 = vector.shape_cast %3 : vector<128xf32> to vector<1x1x128xf32>
      %68 = vector.broadcast %67 : vector<1x1x128xf32> to vector<1x16x128xf32>
      %69 = arith.addf %66, %68 : vector<1x16x128xf32>
      %cst_86 = arith.constant 0.000000e+00 : f32
      %70 = vector.broadcast %cst_86 : f32 to vector<1x16x128xf32>
      %71 = arith.maximumf %69, %70 : vector<1x16x128xf32>
      %c9 = arith.constant 9 : index
      %c1_87 = arith.constant 1 : index
      %c0_88 = arith.constant 0 : index
      %72 = vector.load %arg10[%c9, %c1_87, %c0_88] : memref<10x18x128xf32, #tpu.memory_space<vmem>>, vector<1x16x128xf32>
      tpu.vector_store %arg10[%c9, %c1_87, %c0_88], %71 {strides = array<i32>} : memref<10x18x128xf32, #tpu.memory_space<vmem>>, vector<1x16x128xf32>,
    } else {
    }
    %c1_i32_19 = arith.constant 1 : i32
    %27 = arith.cmpi eq, %arg1, %c1_i32_19 : i32
    %28 = arith.extui %27 : i1 to i32
    %c0_i32_20 = arith.constant 0 : i32
    %29 = arith.cmpi ne, %28, %c0_i32_20 : i32
    scf.if %29 {
      %cst_82 = arith.constant 0.000000e+00 : f32
      %62 = vector.broadcast %cst_82 : f32 to vector<1x16x128xf32>
      %c9 = arith.constant 9 : index
      %c1_83 = arith.constant 1 : index
      %c0_84 = arith.constant 0 : index
      %63 = vector.load %arg10[%c9, %c1_83, %c0_84] : memref<10x18x128xf32, #tpu.memory_space<vmem>>, vector<1x16x128xf32>
      tpu.vector_store %arg10[%c9, %c1_83, %c0_84], %62 {strides = array<i32>} : memref<10x18x128xf32, #tpu.memory_space<vmem>>, vector<1x16x128xf32>,
    } else {
    }
    %c0_21 = arith.constant 0 : index
    %c0_22 = arith.constant 0 : index
    %c0_23 = arith.constant 0 : index
    %30 = vector.load %arg10[%c0_21, %c0_22, %c0_23] : memref<10x18x128xf32, #tpu.memory_space<vmem>>, vector<8x16x128xf32>
    %c0_24 = arith.constant 0 : index
    %c0_25 = arith.constant 0 : index
    %c0_26 = arith.constant 0 : index
    %31 = vector.load %arg11[%c0_24, %c0_25, %c0_26] : memref<8x16x1152xf32, #tpu.memory_space<vmem>>, vector<8x16x128xf32>
    tpu.vector_store %arg11[%c0_24, %c0_25, %c0_26], %30 {strides = array<i32>} : memref<8x16x1152xf32, #tpu.memory_space<vmem>>, vector<8x16x128xf32>,
    %c0_27 = arith.constant 0 : index
    %c1_28 = arith.constant 1 : index
    %c0_29 = arith.constant 0 : index
    %32 = vector.load %arg10[%c0_27, %c1_28, %c0_29] : memref<10x18x128xf32, #tpu.memory_space<vmem>>, vector<8x16x128xf32>
    %c0_30 = arith.constant 0 : index
    %c0_31 = arith.constant 0 : index
    %c128 = arith.constant 128 : index
    %33 = vector.load %arg11[%c0_30, %c0_31, %c128] : memref<8x16x1152xf32, #tpu.memory_space<vmem>>, vector<8x16x128xf32>
    tpu.vector_store %arg11[%c0_30, %c0_31, %c128], %32 {strides = array<i32>} : memref<8x16x1152xf32, #tpu.memory_space<vmem>>, vector<8x16x128xf32>,
    %c0_32 = arith.constant 0 : index
    %c2 = arith.constant 2 : index
    %c0_33 = arith.constant 0 : index
    %34 = vector.load %arg10[%c0_32, %c2, %c0_33] : memref<10x18x128xf32, #tpu.memory_space<vmem>>, vector<8x16x128xf32>
    %c0_34 = arith.constant 0 : index
    %c0_35 = arith.constant 0 : index
    %c256 = arith.constant 256 : index
    %35 = vector.load %arg11[%c0_34, %c0_35, %c256] : memref<8x16x1152xf32, #tpu.memory_space<vmem>>, vector<8x16x128xf32>
    tpu.vector_store %arg11[%c0_34, %c0_35, %c256], %34 {strides = array<i32>} : memref<8x16x1152xf32, #tpu.memory_space<vmem>>, vector<8x16x128xf32>,
    %c1_36 = arith.constant 1 : index
    %c0_37 = arith.constant 0 : index
    %c0_38 = arith.constant 0 : index
    %36 = vector.load %arg10[%c1_36, %c0_37, %c0_38] : memref<10x18x128xf32, #tpu.memory_space<vmem>>, vector<8x16x128xf32>
    %c0_39 = arith.constant 0 : index
    %c0_40 = arith.constant 0 : index
    %c384 = arith.constant 384 : index
    %37 = vector.load %arg11[%c0_39, %c0_40, %c384] : memref<8x16x1152xf32, #tpu.memory_space<vmem>>, vector<8x16x128xf32>
    tpu.vector_store %arg11[%c0_39, %c0_40, %c384], %36 {strides = array<i32>} : memref<8x16x1152xf32, #tpu.memory_space<vmem>>, vector<8x16x128xf32>,
    %c1_41 = arith.constant 1 : index
    %c1_42 = arith.constant 1 : index
    %c0_43 = arith.constant 0 : index
    %38 = vector.load %arg10[%c1_41, %c1_42, %c0_43] : memref<10x18x128xf32, #tpu.memory_space<vmem>>, vector<8x16x128xf32>
    %c0_44 = arith.constant 0 : index
    %c0_45 = arith.constant 0 : index
    %c512 = arith.constant 512 : index
    %39 = vector.load %arg11[%c0_44, %c0_45, %c512] : memref<8x16x1152xf32, #tpu.memory_space<vmem>>, vector<8x16x128xf32>
    tpu.vector_store %arg11[%c0_44, %c0_45, %c512], %38 {strides = array<i32>} : memref<8x16x1152xf32, #tpu.memory_space<vmem>>, vector<8x16x128xf32>,
    %c1_46 = arith.constant 1 : index
    %c2_47 = arith.constant 2 : index
    %c0_48 = arith.constant 0 : index
    %40 = vector.load %arg10[%c1_46, %c2_47, %c0_48] : memref<10x18x128xf32, #tpu.memory_space<vmem>>, vector<8x16x128xf32>
    %c0_49 = arith.constant 0 : index
    %c0_50 = arith.constant 0 : index
    %c640 = arith.constant 640 : index
    %41 = vector.load %arg11[%c0_49, %c0_50, %c640] : memref<8x16x1152xf32, #tpu.memory_space<vmem>>, vector<8x16x128xf32>
    tpu.vector_store %arg11[%c0_49, %c0_50, %c640], %40 {strides = array<i32>} : memref<8x16x1152xf32, #tpu.memory_space<vmem>>, vector<8x16x128xf32>,
    %c2_51 = arith.constant 2 : index
    %c0_52 = arith.constant 0 : index
    %c0_53 = arith.constant 0 : index
    %42 = vector.load %arg10[%c2_51, %c0_52, %c0_53] : memref<10x18x128xf32, #tpu.memory_space<vmem>>, vector<8x16x128xf32>
    %c0_54 = arith.constant 0 : index
    %c0_55 = arith.constant 0 : index
    %c768 = arith.constant 768 : index
    %43 = vector.load %arg11[%c0_54, %c0_55, %c768] : memref<8x16x1152xf32, #tpu.memory_space<vmem>>, vector<8x16x128xf32>
    tpu.vector_store %arg11[%c0_54, %c0_55, %c768], %42 {strides = array<i32>} : memref<8x16x1152xf32, #tpu.memory_space<vmem>>, vector<8x16x128xf32>,
    %c2_56 = arith.constant 2 : index
    %c1_57 = arith.constant 1 : index
    %c0_58 = arith.constant 0 : index
    %44 = vector.load %arg10[%c2_56, %c1_57, %c0_58] : memref<10x18x128xf32, #tpu.memory_space<vmem>>, vector<8x16x128xf32>
    %c0_59 = arith.constant 0 : index
    %c0_60 = arith.constant 0 : index
    %c896 = arith.constant 896 : index
    %45 = vector.load %arg11[%c0_59, %c0_60, %c896] : memref<8x16x1152xf32, #tpu.memory_space<vmem>>, vector<8x16x128xf32>
    tpu.vector_store %arg11[%c0_59, %c0_60, %c896], %44 {strides = array<i32>} : memref<8x16x1152xf32, #tpu.memory_space<vmem>>, vector<8x16x128xf32>,
    %c2_61 = arith.constant 2 : index
    %c2_62 = arith.constant 2 : index
    %c0_63 = arith.constant 0 : index
    %46 = vector.load %arg10[%c2_61, %c2_62, %c0_63] : memref<10x18x128xf32, #tpu.memory_space<vmem>>, vector<8x16x128xf32>
    %c0_64 = arith.constant 0 : index
    %c0_65 = arith.constant 0 : index
    %c1024 = arith.constant 1024 : index
    %47 = vector.load %arg11[%c0_64, %c0_65, %c1024] : memref<8x16x1152xf32, #tpu.memory_space<vmem>>, vector<8x16x128xf32>
    tpu.vector_store %arg11[%c0_64, %c0_65, %c1024], %46 {strides = array<i32>} : memref<8x16x1152xf32, #tpu.memory_space<vmem>>, vector<8x16x128xf32>,
    %c0_66 = arith.constant 0 : index
    %c0_67 = arith.constant 0 : index
    %c0_68 = arith.constant 0 : index
    %48 = vector.load %arg11[%c0_66, %c0_67, %c0_68] : memref<8x16x1152xf32, #tpu.memory_space<vmem>>, vector<8x16x1152xf32>
    %49 = vector.shape_cast %48 : vector<8x16x1152xf32> to vector<128x1152xf32>
    %c0_69 = arith.constant 0 : index
    %c0_70 = arith.constant 0 : index
    %50 = vector.load %arg5[%c0_69, %c0_70] : memref<1152x128xf32, #tpu.memory_space<vmem>>, vector<1152x128xf32>
    %cst_71 = arith.constant dense<0.000000e+00> : vector<128x128xf32>
    %51 = tpu.matmul %49, %50, %cst_71 {dimension_numbers = #tpu.dot_dimension_numbers<[1], [0], [0], [1], [0, 0, 1, 1], [], []>} : vector<128x1152xf32>, vector<1152x128xf32>, vector<128x128xf32> -> vector<128x128xf32>
    %cst_72 = arith.constant dense<0.000000e+00> : vector<128xf32>
    %52 = vector.multi_reduction <add>, %51, %cst_72 [0] : vector<128x128xf32> to vector<128xf32>
    %53 = vector.shape_cast %52 : vector<128xf32> to vector<1x128xf32>
    %54 = arith.mulf %51, %51 : vector<128x128xf32>
    %cst_73 = arith.constant dense<0.000000e+00> : vector<128xf32>
    %55 = vector.multi_reduction <add>, %54, %cst_73 [0] : vector<128x128xf32> to vector<128xf32>
    %56 = vector.shape_cast %55 : vector<128xf32> to vector<1x128xf32>
    %57 = tpu.concatenate %53, %56 in 0 : vector<1x128xf32>, vector<1x128xf32> -> vector<2x128xf32>
    %58 = vector.shape_cast %57 : vector<2x128xf32> to vector<1x1x2x128xf32>
    %c0_74 = arith.constant 0 : index
    %c0_75 = arith.constant 0 : index
    %c0_76 = arith.constant 0 : index
    %c0_77 = arith.constant 0 : index
    %59 = vector.load %arg9[%c0_74, %c0_75, %c0_76, %c0_77] : memref<1x1x2x128xf32, #tpu.memory_space<vmem>>, vector<1x1x2x128xf32>
    tpu.vector_store %arg9[%c0_74, %c0_75, %c0_76, %c0_77], %58 {strides = array<i32>} : memref<1x1x2x128xf32, #tpu.memory_space<vmem>>, vector<1x1x2x128xf32>,
    %60 = vector.shape_cast %51 : vector<128x128xf32> to vector<1x8x16x128xf32>
    %c0_78 = arith.constant 0 : index
    %c0_79 = arith.constant 0 : index
    %c0_80 = arith.constant 0 : index
    %c0_81 = arith.constant 0 : index
    %61 = vector.load %arg8[%c0_78, %c0_79, %c0_80, %c0_81] : memref<1x8x16x128xf32, #tpu.memory_space<vmem>>, vector<1x8x16x128xf32>
    tpu.vector_store %arg8[%c0_78, %c0_79, %c0_80, %c0_81], %60 {strides = array<i32>} : memref<1x8x16x128xf32, #tpu.memory_space<vmem>>, vector<1x8x16x128xf32>,
    return
  }
  func.func @transform_0(%arg0: i32, %arg1: i32) -> (i32, i32, i32, i32) {
    %c0_i32 = arith.constant 0 : i32
    %c0_i32_0 = arith.constant 0 : i32
    %c0_i32_1 = arith.constant 0 : i32
    return %arg0, %arg1, %c0_i32, %c0_i32_0 : i32, i32, i32, i32
  }
  func.func @transform_1(%arg0: i32, %arg1: i32) -> (i32, i32, i32, i32) {
    %c8_i32 = arith.constant 8 : i32
    %0 = arith.muli %arg1, %c8_i32 : i32
    %c1_i32 = arith.constant 1 : i32
    %1 = arith.subi %0, %c1_i32 : i32
    %c0_i32 = arith.constant 0 : i32
    %2 = arith.maxsi %1, %c0_i32 : i32
    %c0_i32_0 = arith.constant 0 : i32
    %c0_i32_1 = arith.constant 0 : i32
    %c0_i32_2 = arith.constant 0 : i32
    return %arg0, %2, %c0_i32_0, %c0_i32_1 : i32, i32, i32, i32
  }
  func.func @transform_2(%arg0: i32, %arg1: i32) -> (i32, i32, i32, i32) {
    %c1_i32 = arith.constant 1 : i32
    %0 = arith.addi %arg1, %c1_i32 : i32
    %c8_i32 = arith.constant 8 : i32
    %1 = arith.muli %0, %c8_i32 : i32
    %c15_i32 = arith.constant 15 : i32
    %2 = arith.minsi %1, %c15_i32 : i32
    %c0_i32 = arith.constant 0 : i32
    %c0_i32_0 = arith.constant 0 : i32
    %c0_i32_1 = arith.constant 0 : i32
    return %arg0, %2, %c0_i32, %c0_i32_0 : i32, i32, i32, i32
  }
  func.func @transform_3(%arg0: i32, %arg1: i32) -> (i32, i32) {
    %c0_i32 = arith.constant 0 : i32
    %c0_i32_0 = arith.constant 0 : i32
    %c0_i32_1 = arith.constant 0 : i32
    return %c0_i32, %c0_i32_0 : i32, i32
  }
  func.func @transform_4(%arg0: i32, %arg1: i32) -> (i32, i32) {
    %c0_i32 = arith.constant 0 : i32
    %c0_i32_0 = arith.constant 0 : i32
    %c0_i32_1 = arith.constant 0 : i32
    return %c0_i32, %c0_i32_0 : i32, i32
  }
  func.func @transform_5(%arg0: i32, %arg1: i32) -> (i32, i32) {
    %c0_i32 = arith.constant 0 : i32
    %c0_i32_0 = arith.constant 0 : i32
    %c0_i32_1 = arith.constant 0 : i32
    return %c0_i32, %c0_i32_0 : i32, i32
  }
  func.func @transform_6(%arg0: i32, %arg1: i32) -> (i32, i32, i32, i32) {
    %c0_i32 = arith.constant 0 : i32
    %c0_i32_0 = arith.constant 0 : i32
    %c0_i32_1 = arith.constant 0 : i32
    return %arg0, %arg1, %c0_i32, %c0_i32_0 : i32, i32, i32, i32
  }
  func.func @transform_7(%arg0: i32, %arg1: i32) -> (i32, i32, i32, i32) {
    %c0_i32 = arith.constant 0 : i32
    %c0_i32_0 = arith.constant 0 : i32
    %c0_i32_1 = arith.constant 0 : i32
    return %arg0, %arg1, %c0_i32, %c0_i32_0 : i32, i32, i32, i32
  }
}

module attributes {stable_mosaic.version = 11 : i64} {
  func.func @_affine_relu_kernel(%arg0: i32, %arg1: i32, %arg2: memref<1x8x16x128xf32, #tpu.memory_space<vmem>>, %arg3: memref<1x128xf32, #tpu.memory_space<vmem>>, %arg4: memref<1x128xf32, #tpu.memory_space<vmem>>, %arg5: memref<1x8x16x128xf32, #tpu.memory_space<vmem>>) attributes {dimension_semantics = [#tpu.dimension_semantics<parallel>, #tpu.dimension_semantics<parallel>], iteration_bounds = array<i64: 2, 2>, scalar_prefetch = 0 : i64, scratch_operands = 0 : i64, tpu.core_type = #tpu.core_type<tc>, window_params = [{transform_indices = @transform_0, window_bounds = array<i64: 1, 8, 16, 128>}, {pipeline_mode = #tpu.pipeline_mode<synchronous>, transform_indices = @transform_1, window_bounds = array<i64: 1, 128>}, {pipeline_mode = #tpu.pipeline_mode<synchronous>, transform_indices = @transform_2, window_bounds = array<i64: 1, 128>}, {transform_indices = @transform_3, window_bounds = array<i64: 1, 8, 16, 128>}]} {
    %c0 = arith.constant 0 : index
    %c0_0 = arith.constant 0 : index
    %c0_1 = arith.constant 0 : index
    %c0_2 = arith.constant 0 : index
    %0 = vector.load %arg2[%c0, %c0_0, %c0_1, %c0_2] : memref<1x8x16x128xf32, #tpu.memory_space<vmem>>, vector<1x8x16x128xf32>
    %c0_3 = arith.constant 0 : index
    %c0_4 = arith.constant 0 : index
    %1 = vector.load %arg3[%c0_3, %c0_4] : memref<1x128xf32, #tpu.memory_space<vmem>>, vector<1x128xf32>
    %2 = vector.shape_cast %1 : vector<1x128xf32> to vector<128xf32>
    %3 = vector.shape_cast %2 : vector<128xf32> to vector<1x1x1x128xf32>
    %4 = vector.broadcast %3 : vector<1x1x1x128xf32> to vector<1x8x16x128xf32>
    %5 = arith.mulf %0, %4 : vector<1x8x16x128xf32>
    %c0_5 = arith.constant 0 : index
    %c0_6 = arith.constant 0 : index
    %6 = vector.load %arg4[%c0_5, %c0_6] : memref<1x128xf32, #tpu.memory_space<vmem>>, vector<1x128xf32>
    %7 = vector.shape_cast %6 : vector<1x128xf32> to vector<128xf32>
    %8 = vector.shape_cast %7 : vector<128xf32> to vector<1x1x1x128xf32>
    %9 = vector.broadcast %8 : vector<1x1x1x128xf32> to vector<1x8x16x128xf32>
    %10 = arith.addf %5, %9 : vector<1x8x16x128xf32>
    %cst = arith.constant 0.000000e+00 : f32
    %11 = vector.broadcast %cst : f32 to vector<1x8x16x128xf32>
    %12 = arith.maximumf %10, %11 : vector<1x8x16x128xf32>
    %c0_7 = arith.constant 0 : index
    %c0_8 = arith.constant 0 : index
    %c0_9 = arith.constant 0 : index
    %c0_10 = arith.constant 0 : index
    %13 = vector.load %arg5[%c0_7, %c0_8, %c0_9, %c0_10] : memref<1x8x16x128xf32, #tpu.memory_space<vmem>>, vector<1x8x16x128xf32>
    tpu.vector_store %arg5[%c0_7, %c0_8, %c0_9, %c0_10], %12 {strides = array<i32>} : memref<1x8x16x128xf32, #tpu.memory_space<vmem>>, vector<1x8x16x128xf32>,
    return
  }
  func.func @transform_0(%arg0: i32, %arg1: i32) -> (i32, i32, i32, i32) {
    %c0_i32 = arith.constant 0 : i32
    %c0_i32_0 = arith.constant 0 : i32
    %c0_i32_1 = arith.constant 0 : i32
    return %arg0, %arg1, %c0_i32, %c0_i32_0 : i32, i32, i32, i32
  }
  func.func @transform_1(%arg0: i32, %arg1: i32) -> (i32, i32) {
    %c0_i32 = arith.constant 0 : i32
    %c0_i32_0 = arith.constant 0 : i32
    %c0_i32_1 = arith.constant 0 : i32
    return %c0_i32, %c0_i32_0 : i32, i32
  }
  func.func @transform_2(%arg0: i32, %arg1: i32) -> (i32, i32) {
    %c0_i32 = arith.constant 0 : i32
    %c0_i32_0 = arith.constant 0 : i32
    %c0_i32_1 = arith.constant 0 : i32
    return %c0_i32, %c0_i32_0 : i32, i32
  }
  func.func @transform_3(%arg0: i32, %arg1: i32) -> (i32, i32, i32, i32) {
    %c0_i32 = arith.constant 0 : i32
    %c0_i32_0 = arith.constant 0 : i32
    %c0_i32_1 = arith.constant 0 : i32
    return %arg0, %arg1, %c0_i32, %c0_i32_0 : i32, i32, i32, i32
  }
}

</mosaic_0001>

<bundles_post_ra>
// kernel: conv_block_forward.3
= control target key start
LH: loop header
LB: loop body
LE: loop exit
PB: predicated region body
PF: predicated region fallthrough
CT: control target
= control target key end

     0   :  { %s889_s12 = smov 0   ;;  %s891_s13 = smov 0   ;;  %s1043_s0 = inlined_call_operand.vmem [shape: f32[2,16,16,128], index: 0, kind: input, shape index: {}]   ;;  %s1044_s1 = inlined_call_operand.vmem [shape: f32[128,128], index: 1, kind: input, shape index: {}]   ;;  %s1045_s2 = inlined_call_operand.vmem [shape: f32[2,16,16,128], index: 2, kind: output, shape index: {0}]   ;;  %s1046_s3 = inlined_call_operand.vmem [shape: f32[2,2,2,128], index: 3, kind: output, shape index: {1}]  }
   0x1   :  { %s893_s14 = smov 0   ;;  %s895_s15 = smov 0  }
   0x2   :  { %s897_s16 = smov 0  }
   0x3 LB: > { %s23_s17 = sadd.s32 1, %s859_s14  ;;  %s26_s18 = sadd.s32 1, %s863_s15  ;;  %s867_s16 = sphi %s897_s16, %s14_s16   ;;  %s863_s15 = sphi %s895_s15, %s1050_s15   ;;  %s859_s14 = sphi %s893_s14, %s1049_s14   ;;  %s855_s13 = sphi %s891_s13, %s1048_s13   ;;  %s851_s12 = sphi %s889_s12, %s1047_s12  }
   0x4   : > { %p24_p0 = scmp.ge.s32.totalorder %s23_s17, 2  ;;  %p640_p1 = scmp.ge.s32.totalorder %s867_s16, 1 }
   0x5   : > { %p164_p2 = scmp.lt.s32.totalorder %s867_s16, 5 }
   0x6   : > { %s1052_s17 = smov (%p24_p0, %s23_s17), 0  ;;  %s1054_s18 = smov (!%p24_p0, %s26_s18), %s863_s15 }
   0x7   : > { %p165_p3 = pnand %p640_p1, %p164_p2  ;;  %p28_p4 = scmp.ge.s32.totalorder %s1054_s18, 2 }
   0x8   : > { %v252_v0 = vld [vmem:[%s1044_s1] sm:$0xff] (!%p165_p3)  ;;  %v253_v1 = vld [vmem:[%s1044_s1 + $0x8] sm:$0xff] (!%p165_p3)  ;;  %v254_v2 = vld [vmem:[%s1044_s1 + $0x10] sm:$0xff] (!%p165_p3)  ;;  %s641_s25 = sshll.u32 (!%p165_p3), %s851_s12, 3  ;;  %p207_p5 = scmp.lt.s32.totalorder (!%p165_p3), %s855_s13, 1  ;;  %vm471_vm0 = vcmask (!%p165_p3), 1040384  }
   0x9   : > { %s1056_s18 = smov (%p28_p4, %s1054_s18), 0  ;;  %168 = sbr.rel (%p165_p3) target bundleno = 305 (0x131), region = 28 }
   0xa   : > { %v741_v3 = vpack.c.bf16 (!%p165_p3), %v253_v1, %v252_v0  ;;  %v255_v4 = vld [vmem:[%s1044_s1 + $0x18] sm:$0xff] (!%p165_p3)  ;;  %p209_p6 = scmp.lt.s32.totalorder (!%p165_p3), %s641_s25, 15  ;;  %v256_v6 = vld [vmem:[%s1044_s1 + $0x20] sm:$0xff] (!%p165_p3)  ;;  %v257_v7 = vld [vmem:[%s1044_s1 + $0x28] sm:$0xff] (!%p165_p3)  ;;  %p230_p7 = scmp.lt.s32.totalorder (!%p165_p3), %s851_s12, 1 }
   0xb   : > { %v745_v5 = vpack.c.bf16 (!%p165_p3), %v255_v4, %v254_v2  ;;  %v749_v8 = vpack.c.bf16 (!%p165_p3), %v257_v7, %v256_v6  ;;  %v258_v9 = vld [vmem:[%s1044_s1 + $0x30] sm:$0xff] (!%p165_p3)  ;;  %v259_v10 = vld [vmem:[%s1044_s1 + $0x38] sm:$0xff] (!%p165_p3)  ;;  %v260_v13 = vld [vmem:[%s1044_s1 + $0x40] sm:$0xff] (!%p165_p3) }
   0xc   : > { %742 = vmatprep.subr.bf16.mxu0 (!%p165_p3), %v741_v3  ;;  %773 = vmatprep.subr.bf16.mxu1 (!%p165_p3), %v741_v3  ;;  %v753_v11 = vpack.c.bf16 (!%p165_p3), %v259_v10, %v258_v9  ;;  %v261_v14 = vld [vmem:[%s1044_s1 + $0x48] sm:$0xff] (!%p165_p3)  ;;  %v262_v17 = vld [vmem:[%s1044_s1 + $0x50] sm:$0xff] (!%p165_p3)  ;;  %v263_v18 = vld [vmem:[%s1044_s1 + $0x58] sm:$0xff] (!%p165_p3) }
   0xd   : > { %744 = vmatpush3.bf16.msra.mxu0 (!%p165_p3), %v741_v3  ;;  %781 = vmatpush3.bf16.msra.mxu1 (!%p165_p3), %v741_v3  ;;  %v757_v16 = vpack.c.bf16 (!%p165_p3), %v261_v14, %v260_v13  ;;  %v761_v19 = vpack.c.bf16 (!%p165_p3), %v263_v18, %v262_v17  ;;  %v264_v20 = vld [vmem:[%s1044_s1 + $0x60] sm:$0xff] (!%p165_p3)  ;;  %v265_v21 = vld [vmem:[%s1044_s1 + $0x68] sm:$0xff] (!%p165_p3)  ;;  %v266_v23 = vld [vmem:[%s1044_s1 + $0x70] sm:$0xff] (!%p165_p3) }
   0xe   : > { %746 = vmatprep.subr.bf16.mxu0 (!%p165_p3), %v745_v5  ;;  %774 = vmatprep.subr.bf16.mxu1 (!%p165_p3), %v745_v5  ;;  %v765_v22 = vpack.c.bf16 (!%p165_p3), %v265_v21, %v264_v20  ;;  %v267_v24 = vld [vmem:[%s1044_s1 + $0x78] sm:$0xff] (!%p165_p3) }
   0xf   : > { %v769_v25 = vpack.c.bf16 (!%p165_p3), %v267_v24, %v266_v23 }
  0x10   : > { %s1058_s13 = smov (!%p207_p5, %s855_s13), 1  ;;  %s1060_s25 = smov (!%p209_p6, %s641_s25), 15 }
  0x11   : > { %s643_s5 = sshll.u32 %s1058_s13, 5  ;;  %s642_s6 = sshll.u32 %s1060_s25, 1  ;;  %748 = vmatpush3.bf16.msra.mxu0 %v745_v5  ;;  %782 = vmatpush3.bf16.msra.mxu1 %v745_v5 }
  0x12   : > { %s949_s11 = sadd.s32 %s643_s5, %s642_s6  ;;  %750 = vmatprep.subr.bf16.mxu0 %v749_v8  ;;  %775 = vmatprep.subr.bf16.mxu1 %v749_v8  ;;  %s1062_s12 = smov (!%p230_p7, %s851_s12), 1 }
  0x13   : > { %s644_s19 = sshll.u32 %s949_s11, 3  ;;  %s649_s11 = sshll.u32 %s1058_s13, 1 }
  0x14   : > { %s957_s22 = scalar_lea.vmem %s1043_s0, %s644_s19  ;;  %s1004_s24 = scalar_lea.vmem %s1045_s2, %s644_s19 }
  0x15   : > { %v236_v12 = vld [vmem:[%s957_s22] sm:$0xff]  ;;  %752 = vmatpush3.bf16.msra.mxu0 %v749_v8  ;;  %783 = vmatpush3.bf16.msra.mxu1 %v749_v8  ;;  %v237_v26 = vld [vmem:[%s957_s22 + $0x8] sm:$0xff]  ;;  %v238_v28 = vld [vmem:[%s957_s22 + $0x10] sm:$0xff]  ;;  %s233_s19 = sadd.s32 %s649_s11, %s1062_s12 }
  0x16   : > { %717 = vmatprep.mubr.f32.mxu0 %v236_v12  ;;  %v244_v15 = vld [vmem:[%s957_s22 + $0x40] sm:$0xff]  ;;  %754 = vmatprep.subr.bf16.mxu0 %v753_v11  ;;  %v245_v27 = vld [vmem:[%s957_s22 + $0x48] sm:$0xff]  ;;  %v246_v29 = vld [vmem:[%s957_s22 + $0x50] sm:$0xff] }
  0x17   : > { %776 = vmatprep.subr.bf16.mxu1 %v753_v11  ;;  %729 = vmatprep.mubr.f32.mxu1 %v244_v15  ;;  %v239_v30 = vld [vmem:[%s957_s22 + $0x18] sm:$0xff]  ;;  %v240_v32 = vld [vmem:[%s957_s22 + $0x20] sm:$0xff]  ;;  %v241_v34 = vld [vmem:[%s957_s22 + $0x28] sm:$0xff] }
  0x18   : > { %v247_v31 = vld [vmem:[%s957_s22 + $0x58] sm:$0xff]  ;;  %v248_v33 = vld [vmem:[%s957_s22 + $0x60] sm:$0xff]  ;;  %v249_v35 = vld [vmem:[%s957_s22 + $0x68] sm:$0xff] }
  0x19   : > { %756 = vmatpush3.bf16.msra.mxu0 %v753_v11  ;;  %784 = vmatpush3.bf16.msra.mxu1 %v753_v11  ;;  %v242_v36 = vld [vmem:[%s957_s22 + $0x30] sm:$0xff]  ;;  %v243_v38 = vld [vmem:[%s957_s22 + $0x38] sm:$0xff] }
  0x1a   : > { %758 = vmatprep.subr.bf16.mxu0 %v757_v16  ;;  %777 = vmatprep.subr.bf16.mxu1 %v757_v16  ;;  %v250_v37 = vld [vmem:[%s957_s22 + $0x70] sm:$0xff]  ;;  %v251_v39 = vld [vmem:[%s957_s22 + $0x78] sm:$0xff]  ;;  %s650_s22 = sshll.u32 %s233_s19, 1 }
  0x1b   : > { %s235_s27 = scalar_lea.vmem %s1046_s3, %s650_s22 }
  0x1d   : > { %760 = vmatpush3.bf16.msra.mxu0 %v757_v16  ;;  %785 = vmatpush3.bf16.msra.mxu1 %v757_v16 }
  0x1e   : > { %762 = vmatprep.subr.bf16.mxu0 %v761_v19  ;;  %778 = vmatprep.subr.bf16.mxu1 %v761_v19 }
  0x21   : > { %764 = vmatpush3.bf16.msra.mxu0 %v761_v19  ;;  %786 = vmatpush3.bf16.msra.mxu1 %v761_v19 }
  0x22   : > { %766 = vmatprep.subr.bf16.mxu0 %v765_v22  ;;  %779 = vmatprep.subr.bf16.mxu1 %v765_v22 }
  0x25   : > { %768 = vmatpush3.bf16.msra.mxu0 %v765_v22  ;;  %787 = vmatpush3.bf16.msra.mxu1 %v765_v22 }
  0x26   : > { %770 = vmatprep.subr.bf16.mxu0 %v769_v25  ;;  %780 = vmatprep.subr.bf16.mxu1 %v769_v25 }
  0x29   : > { %772 = vmatpush3.bf16.msra.mxu0 %v769_v25  ;;  %788 = vmatpush3.bf16.msra.mxu1 %v769_v25 }
  0x2c   : > { %718 = vmatmul.mubr.f32.vlgmr.msra.gmra.mrb[0].mxu0 %v237_v26  ;;  %730 = vmatmul.mubr.f32.vlgmr.msra.gmra.mrb[0].mxu1 %v245_v27 }
  0x2d   : > { %720 = vmatprep.mubr.f32.mxu0 %v238_v28  ;;  %732 = vmatprep.mubr.f32.mxu1 %v246_v29 }
  0x30   : > { %721 = vmatmul.mubr.f32.gmra.mrb[2].mxu0 %v239_v30  ;;  %733 = vmatmul.mubr.f32.gmra.mrb[2].mxu1 %v247_v31 }
  0x31   : > { %723 = vmatprep.mubr.f32.mxu0 %v240_v32  ;;  %735 = vmatprep.mubr.f32.mxu1 %v248_v33 }
  0x34   : > { %724 = vmatmul.mubr.f32.gmra.mrb[4].mxu0 %v241_v34  ;;  %736 = vmatmul.mubr.f32.gmra.mrb[4].mxu1 %v249_v35 }
  0x35   : > { %726 = vmatprep.mubr.f32.mxu0 %v242_v36  ;;  %738 = vmatprep.mubr.f32.mxu1 %v250_v37 }
  0x38   : > { %727 = vmatmul.mubr.f32.gmra.mrb[6].mxu0 %v243_v38  ;;  %739 = vmatmul.mubr.f32.gmra.mrb[6].mxu1 %v251_v39 }
  0xff   : > { %v719_v40 = vpop.f32.mrb[0].mxu0  ;;  %v731_v41 = vpop.f32.mrb[0].mxu1 }
 0x100   : > { %v435_v42 = vmul.f32 %v719_v40, %v719_v40  ;;  %475 = vst [vmem:[%s1004_s24 + $0x8] sm:$0xff] %v719_v40  ;;  %v334_v43 = vpop.f32.mrb[1].mxu0  ;;  %483 = vst [vmem:[%s1004_s24 + $0x48] sm:$0xff] %v731_v41  ;;  %v374_v44 = vpop.f32.mrb[1].mxu1  ;;  %v443_v16 = vmul.f32 %v731_v41, %v731_v41 }
 0x101   : > { %v413_v45 = vadd.f32 %v719_v40, %v334_v43  ;;  %v434_v46 = vmul.f32 %v334_v43, %v334_v43  ;;  %474 = vst [vmem:[%s1004_s24] sm:$0xff] %v334_v43  ;;  %482 = vst [vmem:[%s1004_s24 + $0x40] sm:$0xff] %v374_v44  ;;  %v442_v13 = vmul.f32 %v374_v44, %v374_v44 }
 0x103   : > { %v450_v47 = vadd.f32 %v435_v42, %v434_v46  ;;  %v722_v48 = vpop.f32.mrb[2].mxu0  ;;  %v734_v49 = vpop.f32.mrb[2].mxu1 }
 0x104   : > { %477 = vst [vmem:[%s1004_s24 + $0x18] sm:$0xff] %v722_v48  ;;  %v344_v50 = vpop.f32.mrb[3].mxu0  ;;  %485 = vst [vmem:[%s1004_s24 + $0x58] sm:$0xff] %v734_v49  ;;  %v384_v51 = vpop.f32.mrb[3].mxu1  ;;  %v437_v54 = vmul.f32 %v722_v48, %v722_v48  ;;  %v445_v22 = vmul.f32 %v734_v49, %v734_v49 }
 0x105   : > { %v414_v52 = vadd.f32 %v413_v45, %v344_v50  ;;  %v436_v53 = vmul.f32 %v344_v50, %v344_v50  ;;  %476 = vst [vmem:[%s1004_s24 + $0x10] sm:$0xff] %v344_v50  ;;  %484 = vst [vmem:[%s1004_s24 + $0x50] sm:$0xff] %v384_v51  ;;  %v444_v19 = vmul.f32 %v384_v51, %v384_v51 }
 0x107   : > { %v451_v55 = vadd.f32 %v450_v47, %v436_v53  ;;  %v725_v56 = vpop.f32.mrb[4].mxu0  ;;  %v415_v57 = vadd.f32 %v722_v48, %v414_v52  ;;  %v737_v58 = vpop.f32.mrb[4].mxu1 }
 0x108   : > { %479 = vst [vmem:[%s1004_s24 + $0x28] sm:$0xff] %v725_v56  ;;  %v354_v59 = vpop.f32.mrb[5].mxu0  ;;  %487 = vst [vmem:[%s1004_s24 + $0x68] sm:$0xff] %v737_v58  ;;  %v394_v60 = vpop.f32.mrb[5].mxu1  ;;  %v439_v0 = vmul.f32 %v725_v56, %v725_v56  ;;  %v447_v28 = vmul.f32 %v737_v58, %v737_v58 }
 0x109   : > { %v416_v61 = vadd.f32 %v415_v57, %v354_v59  ;;  %v438_v62 = vmul.f32 %v354_v59, %v354_v59  ;;  %v452_v63 = vadd.f32 %v451_v55, %v437_v54  ;;  %478 = vst [vmem:[%s1004_s24 + $0x20] sm:$0xff] %v354_v59  ;;  %486 = vst [vmem:[%s1004_s24 + $0x60] sm:$0xff] %v394_v60 }
 0x10a   : > { %v446_v25 = vmul.f32 %v394_v60, %v394_v60 }
 0x10b   : > { %v453_v1 = vadd.f32 %v452_v63, %v438_v62  ;;  %v728_v2 = vpop.f32.mrb[6].mxu0  ;;  %v417_v3 = vadd.f32 %v725_v56, %v416_v61  ;;  %v740_v4 = vpop.f32.mrb[6].mxu1 }
 0x10c   : > { %481 = vst [vmem:[%s1004_s24 + $0x38] sm:$0xff] %v728_v2  ;;  %v364_v5 = vpop.f32.mrb[7].mxu0  ;;  %489 = vst [vmem:[%s1004_s24 + $0x78] sm:$0xff] %v740_v4  ;;  %v404_v6 = vpop.f32.mrb[7].mxu1  ;;  %v441_v10 = vmul.f32 %v728_v2, %v728_v2  ;;  %v449_v34 = vmul.f32 %v740_v4, %v740_v4 }
 0x10d   : > { %v418_v7 = vadd.f32 %v417_v3, %v364_v5  ;;  %v440_v8 = vmul.f32 %v364_v5, %v364_v5  ;;  %v454_v9 = vadd.f32 %v453_v1, %v439_v0  ;;  %480 = vst [vmem:[%s1004_s24 + $0x30] sm:$0xff] %v364_v5  ;;  %488 = vst [vmem:[%s1004_s24 + $0x70] sm:$0xff] %v404_v6 }
 0x10e   : > { %v448_v31 = vmul.f32 %v404_v6, %v404_v6 }
 0x10f   : > { %v419_v11 = vadd.f32 %v728_v2, %v418_v7  ;;  %v455_v12 = vadd.f32 %v454_v9, %v440_v8 }
 0x111   : > { %v456_v14 = vadd.f32 %v455_v12, %v441_v10  ;;  %v420_v15 = vadd.f32 %v419_v11, %v374_v44 }
 0x113   : > { %v457_v17 = vadd.f32 %v456_v14, %v442_v13  ;;  %v421_v18 = vadd.f32 %v731_v41, %v420_v15 }
 0x115   : > { %v422_v20 = vadd.f32 %v421_v18, %v384_v51  ;;  %v458_v21 = vadd.f32 %v457_v17, %v443_v16 }
 0x117   : > { %v459_v23 = vadd.f32 %v458_v21, %v444_v19  ;;  %v423_v24 = vadd.f32 %v734_v49, %v422_v20 }
 0x119   : > { %v424_v26 = vadd.f32 %v423_v24, %v394_v60  ;;  %v460_v27 = vadd.f32 %v459_v23, %v445_v22 }
 0x11b   : > { %v461_v29 = vadd.f32 %v460_v27, %v446_v25  ;;  %v425_v30 = vadd.f32 %v737_v58, %v424_v26 }
 0x11d   : > { %v426_v32 = vadd.f32 %v425_v30, %v404_v6  ;;  %v462_v33 = vadd.f32 %v461_v29, %v447_v28 }
 0x11f   : > { %v427_v35 = vadd.f32 %v740_v4, %v426_v32  ;;  %v463_v36 = vadd.f32 %v462_v33, %v448_v31 }
 0x121   : > { %v428_v37 = vrot.slane %v427_v35, 4  ;;  %v464_v38 = vadd.f32 %v463_v36, %v449_v34 }
 0x123   : > { %v429_v39 = vadd.f32 %v428_v37, %v427_v35  ;;  %v465_v40 = vrot.slane %v464_v38, 4 }
 0x125   : > { %v430_v41 = vrot.slane %v429_v39, 2  ;;  %v466_v42 = vadd.f32 %v465_v40, %v464_v38 }
 0x127   : > { %v431_v43 = vadd.f32 %v430_v41, %v429_v39  ;;  %v467_v44 = vrot.slane %v466_v42, 2 }
 0x129   : > { %v432_v45 = vrot.slane %v431_v43, 1  ;;  %v468_v46 = vadd.f32 %v467_v44, %v466_v42 }
 0x12b   : > { %v469_v47 = vrot.slane %v468_v46, 1  ;;  %v433_v48 = vadd.f32 %v432_v45, %v431_v43 }
 0x12d   : > { %v470_v49 = vadd.f32 %v469_v47, %v468_v46 }
 0x12f   : > { %v472_v50 = vsel %vm471_vm0, %v433_v48, %v470_v49 }
 0x130   : > { %473 = vst [vmem:[%s235_s27] sm:$0x3] %v472_v50 }
 0x131 PF: > { %s14_s16 = sadd.s32 1, %s867_s16   ;;  %s1047_s12 = smov %s859_s14 }
 0x132   : > { %p11_p8 = scmp.ge.s32.totalorder %s14_s16, 6   ;;  %s1048_s13 = smov %s863_s15 }
 0x133   : > { %s1049_s14 = smov %s1052_s17  ;;  %s1050_s15 = smov %s1056_s18 }
 0x134   :  { %13 = sbr.rel (!%p11_p8) target bundleno = 3 (0x3), region = 70 }

// kernel: conv_block_forward.5
= control target key start
LH: loop header
LB: loop body
LE: loop exit
PB: predicated region body
PF: predicated region fallthrough
CT: control target
= control target key end

     0   :  { %s525_s12 = smov 0   ;;  %s527_s13 = smov 0   ;;  %s654_s0 = inlined_call_operand.vmem [shape: f32[2,16,16,128], index: 0, kind: input, shape index: {}]   ;;  %s655_s1 = inlined_call_operand.vmem [shape: f32[1,128], index: 1, kind: input, shape index: {}]   ;;  %s656_s2 = inlined_call_operand.vmem [shape: f32[1,128], index: 2, kind: input, shape index: {}]   ;;  %s657_s3 = inlined_call_operand.vmem [shape: f32[2,16,16,128], index: 3, kind: output, shape index: {}]  }
   0x1   :  { %s529_s14 = smov 0   ;;  %s531_s15 = smov 0  }
   0x2   :  { %s533_s16 = smov 0  }
   0x3 LB: > { %s22_s17 = sadd.s32 1, %s495_s14  ;;  %s25_s18 = sadd.s32 1, %s499_s15  ;;  %s503_s16 = sphi %s533_s16, %s13_s16   ;;  %s499_s15 = sphi %s531_s15, %s661_s15   ;;  %s495_s14 = sphi %s529_s14, %s660_s14   ;;  %s491_s13 = sphi %s527_s13, %s659_s13   ;;  %s487_s12 = sphi %s525_s12, %s658_s12  }
   0x4   : > { %p23_p0 = scmp.ge.s32.totalorder %s22_s17, 2  ;;  %p412_p1 = scmp.ge.s32.totalorder %s503_s16, 1 }
   0x5   : > { %p159_p2 = scmp.lt.s32.totalorder %s503_s16, 5 }
   0x6   : > { %s663_s17 = smov (%p23_p0, %s22_s17), 0  ;;  %s665_s18 = smov (!%p23_p0, %s25_s18), %s499_s15 }
   0x7   : > { %p160_p3 = pnand %p412_p1, %p159_p2  ;;  %p27_p4 = scmp.ge.s32.totalorder %s665_s18, 2 }
   0x8   : > { %s413_s19 = sshll.u32 (!%p160_p3), %s487_s12, 3  ;;  %p194_p5 = scmp.lt.s32.totalorder (!%p160_p3), %s491_s13, 1  ;;  %v558_v0 = vld [vmem:[%s655_s1] ss:$0 sm:$0xff] (!%p160_p3) }
   0x9   : > { %s667_s18 = smov (%p27_p4, %s665_s18), 0  ;;  %163 = sbr.rel (%p160_p3) target bundleno = 39 (0x27), region = 32 }
   0xa   : > { %p196_p6 = scmp.lt.s32.totalorder (!%p160_p3), %s413_s19, 15  ;;  %v568_v1 = vld [vmem:[%s656_s2] ss:$0 sm:$0xff] (!%p160_p3) }
  0x10   : > { %s669_s13 = smov (!%p194_p5, %s491_s13), 1  ;;  %s671_s19 = smov (!%p196_p6, %s413_s19), 15 }
  0x11   : > { %s415_s20 = sshll.u32 %s669_s13, 5  ;;  %s414_s21 = sshll.u32 %s671_s19, 1 }
  0x12   : > { %s200_s22 = sadd.s32 %s415_s20, %s414_s21 }
  0x13   : > { %s416_s23 = sshll.u32 %s200_s22, 3 }
  0x14   : > { %s563_s28 = scalar_lea.vmem %s654_s0, %s416_s23  ;;  %s591_s6 = scalar_lea.vmem %s657_s3, %s416_s23 }
  0x15   : > { %v215_v2 = vld [vmem:[%s563_s28] sm:$0xff]  ;;  %v216_v3 = vld [vmem:[%s563_s28 + $0x8] sm:$0xff]  ;;  %v217_v4 = vld [vmem:[%s563_s28 + $0x10] sm:$0xff] }
  0x16   : > { %v238_v5 = vmul.f32 %v558_v0, %v215_v2  ;;  %v239_v6 = vmul.f32 %v558_v0, %v216_v3  ;;  %v240_v7 = vmul.f32 %v558_v0, %v217_v4  ;;  %v218_v8 = vld [vmem:[%s563_s28 + $0x18] sm:$0xff]  ;;  %v219_v9 = vld [vmem:[%s563_s28 + $0x20] sm:$0xff]  ;;  %v220_v10 = vld [vmem:[%s563_s28 + $0x28] sm:$0xff] }
  0x17   : > { %v241_v11 = vmul.f32 %v558_v0, %v218_v8  ;;  %v242_v12 = vmul.f32 %v558_v0, %v219_v9  ;;  %v243_v13 = vmul.f32 %v558_v0, %v220_v10  ;;  %v221_v14 = vld [vmem:[%s563_s28 + $0x30] sm:$0xff]  ;;  %v222_v15 = vld [vmem:[%s563_s28 + $0x38] sm:$0xff]  ;;  %v223_v24 = vld [vmem:[%s563_s28 + $0x40] sm:$0xff] }
  0x18   : > { %v261_v16 = vadd.f32 %v568_v1, %v238_v5  ;;  %v262_v17 = vadd.f32 %v568_v1, %v239_v6  ;;  %v263_v18 = vadd.f32 %v568_v1, %v240_v7  ;;  %v244_v19 = vmul.f32 %v558_v0, %v221_v14  ;;  %v224_v25 = vld [vmem:[%s563_s28 + $0x48] sm:$0xff]  ;;  %v225_v26 = vld [vmem:[%s563_s28 + $0x50] sm:$0xff]  ;;  %v226_v31 = vld [vmem:[%s563_s28 + $0x58] sm:$0xff] }
  0x19   : > { %v264_v20 = vadd.f32 %v568_v1, %v241_v11  ;;  %v265_v21 = vadd.f32 %v568_v1, %v242_v12  ;;  %v266_v22 = vadd.f32 %v568_v1, %v243_v13  ;;  %v245_v23 = vmul.f32 %v558_v0, %v222_v15  ;;  %v227_v32 = vld [vmem:[%s563_s28 + $0x60] sm:$0xff]  ;;  %v228_v33 = vld [vmem:[%s563_s28 + $0x68] sm:$0xff]  ;;  %v229_v38 = vld [vmem:[%s563_s28 + $0x70] sm:$0xff] }
  0x1a   : > { %v277_v27 = vmax.f32 %v261_v16, 0.0  ;;  %v278_v28 = vmax.f32 %v262_v17, 0.0  ;;  %v279_v29 = vmax.f32 %v263_v18, 0.0  ;;  %v267_v30 = vadd.f32 %v568_v1, %v244_v19  ;;  %v230_v43 = vld [vmem:[%s563_s28 + $0x78] sm:$0xff] }
  0x1b   : > { %v280_v34 = vmax.f32 %v264_v20, 0.0  ;;  %v281_v35 = vmax.f32 %v265_v21, 0.0  ;;  %v282_v36 = vmax.f32 %v266_v22, 0.0  ;;  %v268_v37 = vadd.f32 %v568_v1, %v245_v23 }
  0x1c   : > { %293 = vst [vmem:[%s591_s6] sm:$0xff] %v277_v27  ;;  %294 = vst [vmem:[%s591_s6 + $0x8] sm:$0xff] %v278_v28  ;;  %v283_v39 = vmax.f32 %v267_v30, 0.0  ;;  %v246_v40 = vmul.f32 %v558_v0, %v223_v24  ;;  %v247_v41 = vmul.f32 %v558_v0, %v224_v25  ;;  %v248_v42 = vmul.f32 %v558_v0, %v225_v26 }
  0x1d   : > { %295 = vst [vmem:[%s591_s6 + $0x10] sm:$0xff] %v279_v29  ;;  %296 = vst [vmem:[%s591_s6 + $0x18] sm:$0xff] %v280_v34  ;;  %v284_v44 = vmax.f32 %v268_v37, 0.0  ;;  %v249_v45 = vmul.f32 %v558_v0, %v226_v31  ;;  %v250_v46 = vmul.f32 %v558_v0, %v227_v32  ;;  %v251_v47 = vmul.f32 %v558_v0, %v228_v33 }
  0x1e   : > { %297 = vst [vmem:[%s591_s6 + $0x20] sm:$0xff] %v281_v35  ;;  %298 = vst [vmem:[%s591_s6 + $0x28] sm:$0xff] %v282_v36  ;;  %v269_v48 = vadd.f32 %v568_v1, %v246_v40  ;;  %v270_v49 = vadd.f32 %v568_v1, %v247_v41  ;;  %v271_v50 = vadd.f32 %v568_v1, %v248_v42 }
  0x1f   : > { %299 = vst [vmem:[%s591_s6 + $0x30] sm:$0xff] %v283_v39  ;;  %v252_v51 = vmul.f32 %v558_v0, %v229_v38  ;;  %300 = vst [vmem:[%s591_s6 + $0x38] sm:$0xff] %v284_v44  ;;  %v272_v52 = vadd.f32 %v568_v1, %v249_v45  ;;  %v273_v53 = vadd.f32 %v568_v1, %v250_v46 }
  0x20   : > { %v274_v54 = vadd.f32 %v568_v1, %v251_v47  ;;  %v253_v55 = vmul.f32 %v558_v0, %v230_v43  ;;  %v285_v56 = vmax.f32 %v269_v48, 0.0  ;;  %v286_v57 = vmax.f32 %v270_v49, 0.0 }
  0x21   : > { %v287_v58 = vmax.f32 %v271_v50, 0.0  ;;  %v275_v59 = vadd.f32 %v568_v1, %v252_v51  ;;  %v288_v60 = vmax.f32 %v272_v52, 0.0  ;;  %v289_v61 = vmax.f32 %v273_v53, 0.0 }
  0x22   : > { %v290_v62 = vmax.f32 %v274_v54, 0.0  ;;  %v276_v63 = vadd.f32 %v568_v1, %v253_v55  ;;  %301 = vst [vmem:[%s591_s6 + $0x40] sm:$0xff] %v285_v56  ;;  %302 = vst [vmem:[%s591_s6 + $0x48] sm:$0xff] %v286_v57 }
  0x23   : > { %303 = vst [vmem:[%s591_s6 + $0x50] sm:$0xff] %v287_v58  ;;  %v291_v2 = vmax.f32 %v275_v59, 0.0  ;;  %304 = vst [vmem:[%s591_s6 + $0x58] sm:$0xff] %v288_v60 }
  0x24   : > { %305 = vst [vmem:[%s591_s6 + $0x60] sm:$0xff] %v289_v61  ;;  %306 = vst [vmem:[%s591_s6 + $0x68] sm:$0xff] %v290_v62  ;;  %v292_v0 = vmax.f32 %v276_v63, 0.0 }
  0x25   : > { %307 = vst [vmem:[%s591_s6 + $0x70] sm:$0xff] %v291_v2 }
  0x26   : > { %308 = vst [vmem:[%s591_s6 + $0x78] sm:$0xff] %v292_v0 }
  0x27 PF: > { %s13_s16 = sadd.s32 1, %s503_s16   ;;  %s658_s12 = smov %s495_s14 }
  0x28   : > { %p10_p7 = scmp.ge.s32.totalorder %s13_s16, 6   ;;  %s659_s13 = smov %s499_s15 }
  0x29   : > { %s660_s14 = smov %s663_s17  ;;  %s661_s15 = smov %s667_s18 }
  0x2a   :  { %12 = sbr.rel (!%p10_p7) target bundleno = 3 (0x3), region = 62 }

// kernel: conv_block_forward.4
= control target key start
LH: loop header
LB: loop body
LE: loop exit
PB: predicated region body
PF: predicated region fallthrough
CT: control target
= control target key end

     0   :  { %s2956_s24 = smov 0   ;;  %s2958_s25 = smov 0   ;;  %s3888_s0 = inlined_call_operand.vmem [shape: f32[2,16,16,128], index: 0, kind: input, shape index: {}, may-alias: {0,1,2}]   ;;  %s3889_s1 = inlined_call_operand.vmem [shape: f32[2,16,16,128], index: 1, kind: input, shape index: {}, may-alias: {0,1,2}]   ;;  %s3890_s2 = inlined_call_operand.vmem [shape: f32[2,16,16,128], index: 2, kind: input, shape index: {}, may-alias: {0,1,2}]   ;;  %s3891_s3 = inlined_call_operand.vmem [shape: f32[1152,128], index: 3, kind: input, shape index: {}]   ;;  %s3892_s4 = inlined_call_operand.vmem [shape: f32[1,128], index: 4, kind: input, shape index: {}]   ;;  %s3893_s5 = inlined_call_operand.vmem [shape: f32[1,128], index: 5, kind: input, shape index: {}]   ;;  %s3894_s6 = inlined_call_operand.vmem [shape: f32[2,16,16,128], index: 6, kind: output, shape index: {0}]   ;;  %s3895_s7 = inlined_call_operand.vmem [shape: f32[2,2,2,128], index: 7, kind: output, shape index: {1}]  }
   0x1   :  { %s2960_s26 = smov 0   ;;  %s2962_s27 = smov 0  }
   0x2   :  { %s2964_s28 = smov 0  }
   0x3 LB: > { %s27_s29 = sadd.s32 1, %s2903_s26  ;;  %s30_s30 = sadd.s32 1, %s2907_s27  ;;  %s2911_s28 = sphi %s2964_s28, %s18_s28   ;;  %s2907_s27 = sphi %s2962_s27, %s3900_s27   ;;  %s2903_s26 = sphi %s2960_s26, %s3899_s26   ;;  %s2899_s25 = sphi %s2958_s25, %s3898_s25   ;;  %s2895_s24 = sphi %s2956_s24, %s3897_s24  }
   0x4   : > { %p28_p0 = scmp.ge.s32.totalorder %s27_s29, 2  ;;  %p2202_p1 = scmp.ge.s32.totalorder %s2911_s28, 1 }
   0x5   : > { %p328_p2 = scmp.lt.s32.totalorder %s2911_s28, 5 }
   0x6   : > { %s3902_s29 = smov (%p28_p0, %s27_s29), 0  ;;  %s3904_s30 = smov (!%p28_p0, %s30_s30), %s2907_s27 }
   0x7   : > { %p329_p3 = pnand %p2202_p1, %p328_p2  ;;  %p32_p4 = scmp.ge.s32.totalorder %s3904_s30, 2 }
   0x8   : > { %s2991_s8 = sshll.u32 (!%p329_p3), %s2895_s24, 3  ;;  %p405_p5 = scmp.lt.s32.totalorder (!%p329_p3), %s2899_s25, 1  ;;  %v2913_v0 = vmov (!%p329_p3), 0.0   ;;  %v3014_v1 = vld [vmem:[%s3892_s4] ss:$0 sm:$0xff] (!%p329_p3) }
   0x9   : > { %s3906_s30 = smov (%p32_p4, %s3904_s30), 0  ;;  %332 = sbr.rel (%p329_p3) target bundleno = 497 (0x1f1), region = 44 }
   0xa   : > { %470 = vst [vmem:[#allocation2] sm:$0x1] (!%p329_p3), %v2913_v0  ;;  %471 = vst [vmem:[#allocation2 + $0x18] sm:$0x1] (!%p329_p3), %v2913_v0  ;;  %p407_p6 = scmp.lt.s32.totalorder (!%p329_p3), %s2991_s8, 15  ;;  %s2208_s9 = sadd.s32 (!%p329_p3), 4294967295, %s2991_s8 }
   0xb   : > { %472 = vst [vmem:[#allocation2 + $0x30] sm:$0x1] (!%p329_p3), %v2913_v0  ;;  %473 = vst [vmem:[#allocation2 + $0x48] sm:$0x1] (!%p329_p3), %v2913_v0  ;;  %p417_p7 = scmp.gt.s32.totalorder (!%p329_p3), %s2208_s9, 0  ;;  %p2209_p8 = scmp.lt.s32.totalorder (!%p329_p3), %s2208_s9, 15 }
   0xc   : > { %474 = vst [vmem:[#allocation2 + $0x60] sm:$0x1] (!%p329_p3), %v2913_v0  ;;  %475 = vst [vmem:[#allocation2 + $0x78] sm:$0x1] (!%p329_p3), %v2913_v0  ;;  %s2245_s14 = sadd.s32 (!%p329_p3), 8, %s2991_s8  ;;  %p462_p10 = scmp.lt.s32.totalorder (!%p329_p3), %s2895_s24, 1 }
   0xd   : > { %476 = vst [vmem:[#allocation2 + $0x90] sm:$0x1] (!%p329_p3), %v2913_v0  ;;  %477 = vst [vmem:[#allocation2 + $0xa8] sm:$0x1] (!%p329_p3), %v2913_v0  ;;  %p3007_p9 = scmp.lt.s32.totalorder (!%p329_p3), %s2245_s14, 15  ;;  %p2232_p11 = scmp.le.s32.totalorder (!%p329_p3), %s2895_s24, 0 }
   0xe   : > { %478 = vst [vmem:[#allocation2 + $0xc0] sm:$0x1] (!%p329_p3), %v2913_v0  ;;  %479 = vst [vmem:[#allocation2 + $0xd8] sm:$0x1] (!%p329_p3), %v2913_v0  ;;  %v3029_v2 = vld [vmem:[%s3893_s5] ss:$0 sm:$0xff] (!%p329_p3) }
   0xf   : > { %480 = vst [vmem:[#allocation2 + $0x11] sm:$0x1] (!%p329_p3), %v2913_v0  ;;  %481 = vst [vmem:[#allocation2 + $0x29] sm:$0x1] (!%p329_p3), %v2913_v0 }
  0x10   : > { %482 = vst [vmem:[#allocation2 + $0x41] sm:$0x1] %v2913_v0  ;;  %483 = vst [vmem:[#allocation2 + $0x59] sm:$0x1] %v2913_v0  ;;  %s3908_s25 = smov (!%p405_p5, %s2899_s25), 1  ;;  %s3910_s14 = smov (!%p3007_p9, %s2245_s14), 15 }
  0x11   : > { %484 = vst [vmem:[#allocation2 + $0x71] sm:$0x1] %v2913_v0  ;;  %485 = vst [vmem:[#allocation2 + $0x89] sm:$0x1] %v2913_v0  ;;  %s408_s10 = scalar_select %p407_p6, %s2991_s8, 15 }
  0x12   : > { %486 = vst [vmem:[#allocation2 + $0xa1] sm:$0x1] %v2913_v0  ;;  %487 = vst [vmem:[#allocation2 + $0xb9] sm:$0x1] %v2913_v0  ;;  %s3003_s11 = sshll.u32 %s3908_s25, 5  ;;  %s3914_s14 = smov (!%p3007_p9, %s3910_s14), 15 }
  0x13   : > { %488 = vst [vmem:[#allocation2 + $0xd1] sm:$0x1] %v2913_v0  ;;  %489 = vst [vmem:[#allocation2 + $0xe9] sm:$0x1] %v2913_v0  ;;  %s2204_s12 = sshll.u32 %s408_s10, 1  ;;  %s2221_s16 = sshll.u32 %s3914_s14, 1 }
  0x14   : > { %s411_s13 = sadd.s32 %s3003_s11, %s2204_s12  ;;  %s442_s18 = sadd.s32 %s2221_s16, %s3003_s11 }
  0x15   : > { %s2206_s15 = sshll.u32 %s411_s13, 3  ;;  %s2223_s22 = sshll.u32 %s442_s18, 3 }
  0x16   : > { %s3019_s21 = scalar_lea.vmem %s3888_s0, %s2206_s15  ;;  %s3024_s8 = scalar_lea.vmem %s3894_s6, %s2206_s15 }
  0x17   : > { %s418_s13 = scalar_select %p417_p7, %s2208_s9, 0  ;;  %v490_v3 = vld [vmem:[%s3019_s21] sm:$0xff]  ;;  %v491_v4 = vld [vmem:[%s3019_s21 + $0x8] sm:$0xff]  ;;  %v492_v5 = vld [vmem:[%s3019_s21 + $0x10] sm:$0xff] }
  0x18   : > { %v512_v6 = vmul.f32 %v3014_v1, %v490_v3  ;;  %v513_v7 = vmul.f32 %v3014_v1, %v491_v4  ;;  %v514_v8 = vmul.f32 %v3014_v1, %v492_v5  ;;  %v493_v9 = vld [vmem:[%s3019_s21 + $0x18] sm:$0xff]  ;;  %v494_v10 = vld [vmem:[%s3019_s21 + $0x20] sm:$0xff]  ;;  %v495_v11 = vld [vmem:[%s3019_s21 + $0x28] sm:$0xff]  ;;  %s3085_s10 = scalar_lea.vmem %s3890_s2, %s2223_s22  ;;  %s2228_s12 = sshll.u32 %s3908_s25, 1 }
  0x19   : > { %s3912_s13 = smov (!%p2209_p8, %s418_s13), 15  ;;  %v515_v12 = vmul.f32 %v3014_v1, %v493_v9  ;;  %v516_v13 = vmul.f32 %v3014_v1, %v494_v10  ;;  %v517_v14 = vmul.f32 %v3014_v1, %v495_v11  ;;  %v496_v15 = vld [vmem:[%s3019_s21 + $0x30] sm:$0xff]  ;;  %v497_v16 = vld [vmem:[%s3019_s21 + $0x38] sm:$0xff]  ;;  %v498_v21 = vld [vmem:[%s3019_s21 + $0x40] sm:$0xff] }
  0x1a   : > { %v534_v17 = vadd.f32 %v3029_v2, %v512_v6  ;;  %v535_v18 = vadd.f32 %v3029_v2, %v513_v7  ;;  %v536_v19 = vadd.f32 %v3029_v2, %v514_v8  ;;  %v518_v20 = vmul.f32 %v3014_v1, %v496_v15  ;;  %s2214_s9 = sshll.u32 %s3912_s13, 1  ;;  %v499_v26 = vld [vmem:[%s3019_s21 + $0x48] sm:$0xff]  ;;  %v500_v27 = vld [vmem:[%s3019_s21 + $0x50] sm:$0xff]  ;;  %v501_v28 = vld [vmem:[%s3019_s21 + $0x58] sm:$0xff] }
  0x1b   : > { %v537_v22 = vadd.f32 %v3029_v2, %v515_v12  ;;  %v538_v23 = vadd.f32 %v3029_v2, %v516_v13  ;;  %v539_v24 = vadd.f32 %v3029_v2, %v517_v14  ;;  %v519_v25 = vmul.f32 %v3014_v1, %v497_v16  ;;  %s425_s15 = sadd.s32 %s2214_s9, %s3003_s11  ;;  %v502_v33 = vld [vmem:[%s3019_s21 + $0x60] sm:$0xff]  ;;  %v503_v34 = vld [vmem:[%s3019_s21 + $0x68] sm:$0xff]  ;;  %v504_v39 = vld [vmem:[%s3019_s21 + $0x70] sm:$0xff] }
  0x1c   : > { %v550_v29 = vmax.f32 %v534_v17, 0.0  ;;  %v551_v30 = vmax.f32 %v535_v18, 0.0  ;;  %v552_v31 = vmax.f32 %v536_v19, 0.0  ;;  %v540_v32 = vadd.f32 %v3029_v2, %v518_v20  ;;  %s2216_s17 = sshll.u32 %s425_s15, 3  ;;  %v505_v44 = vld [vmem:[%s3019_s21 + $0x78] sm:$0xff] }
  0x1d   : > { %v553_v35 = vmax.f32 %v537_v22, 0.0  ;;  %v554_v36 = vmax.f32 %v538_v23, 0.0  ;;  %v555_v37 = vmax.f32 %v539_v24, 0.0  ;;  %v541_v38 = vadd.f32 %v3029_v2, %v519_v25  ;;  %s3076_s14 = scalar_lea.vmem %s3889_s1, %s2216_s17 }
  0x1e   : > { %567 = vst [vmem:[#allocation2 + $0x19] sm:$0xff] %v550_v29  ;;  %568 = vst [vmem:[#allocation2 + $0x21] sm:$0xff] %v551_v30  ;;  %v556_v40 = vmax.f32 %v540_v32, 0.0  ;;  %v520_v41 = vmul.f32 %v3014_v1, %v498_v21  ;;  %v521_v42 = vmul.f32 %v3014_v1, %v499_v26  ;;  %v522_v43 = vmul.f32 %v3014_v1, %v500_v27  ;;  %s463_s13 = scalar_select %p462_p10, %s2895_s24, 1 }
  0x1f   : > { %569 = vst [vmem:[#allocation2 + $0x31] sm:$0xff] %v552_v31  ;;  %570 = vst [vmem:[#allocation2 + $0x39] sm:$0xff] %v553_v35  ;;  %v557_v45 = vmax.f32 %v541_v38, 0.0  ;;  %v523_v46 = vmul.f32 %v3014_v1, %v501_v28  ;;  %v524_v47 = vmul.f32 %v3014_v1, %v502_v33  ;;  %v525_v48 = vmul.f32 %v3014_v1, %v503_v34  ;;  %v587_v5 = vld [vmem:[%s3076_s14] sm:$0xff] (!%p2232_p11)  ;;  %v588_v6 = vld [vmem:[%s3076_s14 + $0x8] sm:$0xff] (!%p2232_p11) }
  0x20   : > { %571 = vst [vmem:[#allocation2 + $0x49] sm:$0xff] %v554_v36  ;;  %572 = vst [vmem:[#allocation2 + $0x51] sm:$0xff] %v555_v37  ;;  %v542_v49 = vadd.f32 %v3029_v2, %v520_v41  ;;  %v543_v50 = vadd.f32 %v3029_v2, %v521_v42  ;;  %v544_v51 = vadd.f32 %v3029_v2, %v522_v43  ;;  %s465_s25 = sadd.s32 %s2228_s12, %s463_s13 }
  0x21   : > { %573 = vst [vmem:[#allocation2 + $0x61] sm:$0xff] %v556_v40  ;;  %v526_v52 = vmul.f32 %v3014_v1, %v504_v39  ;;  %574 = vst [vmem:[#allocation2 + $0x69] sm:$0xff] %v557_v45  ;;  %v545_v53 = vadd.f32 %v3029_v2, %v523_v46  ;;  %v546_v54 = vadd.f32 %v3029_v2, %v524_v47  ;;  %s2229_s21 = sshll.u32 %s465_s25, 1 }
  0x22   : > { %v547_v55 = vadd.f32 %v3029_v2, %v525_v48  ;;  %v527_v56 = vmul.f32 %v3014_v1, %v505_v44  ;;  %v558_v57 = vmax.f32 %v542_v49, 0.0  ;;  %v559_v58 = vmax.f32 %v543_v50, 0.0  ;;  %s3107_s16 = scalar_lea.vmem %s3895_s7, %s2229_s21  ;;  %586 = sbr.rel (%p2232_p11) target bundleno = 43 (0x2b), region = 48 }
  0x23   : > { %v560_v59 = vmax.f32 %v544_v51, 0.0  ;;  %v548_v60 = vadd.f32 %v3029_v2, %v526_v52  ;;  %v561_v61 = vmax.f32 %v545_v53, 0.0  ;;  %v562_v62 = vmax.f32 %v546_v54, 0.0 }
  0x24   : > { %v563_v63 = vmax.f32 %v547_v55, 0.0  ;;  %v549_v0 = vadd.f32 %v3029_v2, %v527_v56  ;;  %575 = vst [vmem:[#allocation2 + $0x79] sm:$0xff] %v558_v57  ;;  %576 = vst [vmem:[#allocation2 + $0x81] sm:$0xff] %v559_v58  ;;  %v589_v7 = vmul.f32 (!%p2232_p11), %v3014_v1, %v587_v5  ;;  %v590_v8 = vmul.f32 (!%p2232_p11), %v3014_v1, %v588_v6 }
  0x25   : > { %577 = vst [vmem:[#allocation2 + $0x91] sm:$0xff] %v560_v59  ;;  %v564_v3 = vmax.f32 %v548_v60, 0.0  ;;  %578 = vst [vmem:[#allocation2 + $0x99] sm:$0xff] %v561_v61 }
  0x26   : > { %579 = vst [vmem:[#allocation2 + $0xa9] sm:$0xff] %v562_v62  ;;  %580 = vst [vmem:[#allocation2 + $0xb1] sm:$0xff] %v563_v63  ;;  %v565_v4 = vmax.f32 %v549_v0, 0.0  ;;  %v591_v9 = vadd.f32 (!%p2232_p11), %v3029_v2, %v589_v7  ;;  %v592_v10 = vadd.f32 (!%p2232_p11), %v3029_v2, %v590_v8 }
  0x27   : > { %581 = vst [vmem:[#allocation2 + $0xc1] sm:$0xff] %v564_v3 }
  0x28   : > { %582 = vst [vmem:[#allocation2 + $0xc9] sm:$0xff] %v565_v4  ;;  %v593_v11 = vmax.f32 (!%p2232_p11), %v591_v9, 0.0  ;;  %v594_v12 = vmax.f32 (!%p2232_p11), %v592_v10, 0.0 }
  0x2a   : > { %595 = vst [vmem:[#allocation2 + $0x1] sm:$0xff] %v593_v11  ;;  %596 = vst [vmem:[#allocation2 + $0x9] sm:$0xff] %v594_v12 }
  0x2b PF: > { %p2233_p12 = scmp.ne.s32.totalorder %s2895_s24, 0 }
  0x2c   : > { %v2914_v13 = vmov (!%p2233_p12), 0.0  }
  0x2d   : > { %600 = sbr.rel (%p2233_p12) target bundleno = 52 (0x34), region = 52  ;;  %601 = vst [vmem:[#allocation2 + $0x1] sm:$0xff] (!%p2233_p12), %v2914_v13  ;;  %602 = vst [vmem:[#allocation2 + $0x9] sm:$0xff] (!%p2233_p12), %v2914_v13 }
  0x34 PF: > { %p2234_p13 = scmp.ge.s32.totalorder %s2895_s24, 1 }
  0x35   : > { %v607_v14 = vld [vmem:[%s3085_s10] sm:$0xff] (!%p2234_p13)  ;;  %v608_v15 = vld [vmem:[%s3085_s10 + $0x8] sm:$0xff] (!%p2234_p13) }
  0x36   : > { %606 = sbr.rel (%p2234_p13) target bundleno = 61 (0x3d), region = 56  ;;  %v609_v16 = vmul.f32 (!%p2234_p13), %v3014_v1, %v607_v14  ;;  %v610_v17 = vmul.f32 (!%p2234_p13), %v3014_v1, %v608_v15 }
  0x38   : > { %v611_v18 = vadd.f32 (!%p2234_p13), %v3029_v2, %v609_v16  ;;  %v612_v19 = vadd.f32 (!%p2234_p13), %v3029_v2, %v610_v17 }
  0x3a   : > { %v613_v20 = vmax.f32 (!%p2234_p13), %v611_v18, 0.0  ;;  %v614_v21 = vmax.f32 (!%p2234_p13), %v612_v19, 0.0 }
  0x3c   : > { %616 = vst [vmem:[#allocation2 + $0xd9] sm:$0xff] (!%p2234_p13), %v613_v20  ;;  %617 = vst [vmem:[#allocation2 + $0xe1] sm:$0xff] (!%p2234_p13), %v614_v21 }
  0x3d PF: > { %p2235_p0 = scmp.ne.s32.totalorder %s2895_s24, 1 }
  0x3e   : > { %v2915_v22 = vmov (!%p2235_p0), 0.0  }
  0x3f   : > { %621 = sbr.rel (%p2235_p0) target bundleno = 70 (0x46), region = 60  ;;  %623 = vst [vmem:[#allocation2 + $0xd9] sm:$0xff] (!%p2235_p0), %v2915_v22  ;;  %624 = vst [vmem:[#allocation2 + $0xe1] sm:$0xff] (!%p2235_p0), %v2915_v22 }
  0x46 PF: > { %v1074_v1 = vld [vmem:[%s3891_s3 + $0x80] sm:$0xff]  ;;  %v1075_v2 = vld [vmem:[%s3891_s3 + $0x88] sm:$0xff]  ;;  %v1076_v32 = vld [vmem:[%s3891_s3 + $0x90] sm:$0xff]  ;;  %vm1985_vm0 = vcmask 1040384  }
  0x47   : > { %v1106_v23 = vld [vmem:[%s3891_s3 + $0x180] sm:$0xff]  ;;  %v2654_v24 = vpack.c.bf16 %v1075_v2, %v1074_v1  ;;  %v1107_v25 = vld [vmem:[%s3891_s3 + $0x188] sm:$0xff]  ;;  %v1077_v34 = vld [vmem:[%s3891_s3 + $0x98] sm:$0xff] }
  0x48   : > { %v1058_v26 = vld [vmem:[%s3891_s3] sm:$0xff]  ;;  %v1059_v27 = vld [vmem:[%s3891_s3 + $0x8] sm:$0xff]  ;;  %v2686_v28 = vpack.c.bf16 %v1107_v25, %v1106_v23  ;;  %v1108_v35 = vld [vmem:[%s3891_s3 + $0x190] sm:$0xff]  ;;  %v2658_v37 = vpack.c.bf16 %v1077_v34, %v1076_v32 }
  0x49   : > { %v2656_v29 = vpack.c.bf16 %v1059_v27, %v1058_v26  ;;  %v1090_v30 = vld [vmem:[%s3891_s3 + $0x100] sm:$0xff]  ;;  %v1091_v31 = vld [vmem:[%s3891_s3 + $0x108] sm:$0xff]  ;;  %2655 = vmatprep.subr.bf16.mxu0 %v2654_v24  ;;  %v1109_v36 = vld [vmem:[%s3891_s3 + $0x198] sm:$0xff] }
  0x4a   : > { %v2688_v33 = vpack.c.bf16 %v1091_v31, %v1090_v30  ;;  %2687 = vmatprep.subr.bf16.mxu1 %v2686_v28  ;;  %v2690_v38 = vpack.c.bf16 %v1109_v36, %v1108_v35  ;;  %v1060_v39 = vld [vmem:[%s3891_s3 + $0x10] sm:$0xff]  ;;  %v1061_v40 = vld [vmem:[%s3891_s3 + $0x18] sm:$0xff]  ;;  %v1078_v44 = vld [vmem:[%s3891_s3 + $0xa0] sm:$0xff] }
  0x4b   : > { %2657 = vmatpush3.bf16.msra.mxu0 %v2656_v29  ;;  %v1092_v41 = vld [vmem:[%s3891_s3 + $0x110] sm:$0xff]  ;;  %v2660_v42 = vpack.c.bf16 %v1061_v40, %v1060_v39  ;;  %v1093_v43 = vld [vmem:[%s3891_s3 + $0x118] sm:$0xff]  ;;  %v1079_v45 = vld [vmem:[%s3891_s3 + $0xa8] sm:$0xff] }
  0x4c   : > { %2689 = vmatpush3.bf16.msra.mxu1 %v2688_v33  ;;  %2659 = vmatprep.subr.bf16.mxu0 %v2658_v37  ;;  %v2692_v46 = vpack.c.bf16 %v1093_v43, %v1092_v41  ;;  %v2662_v47 = vpack.c.bf16 %v1079_v45, %v1078_v44  ;;  %v1110_v48 = vld [vmem:[%s3891_s3 + $0x1a0] sm:$0xff]  ;;  %v1111_v49 = vld [vmem:[%s3891_s3 + $0x1a8] sm:$0xff]  ;;  %v1080_v56 = vld [vmem:[%s3891_s3 + $0xb0] sm:$0xff] }
  0x4d   : > { %2691 = vmatprep.subr.bf16.mxu1 %v2690_v38  ;;  %v1062_v50 = vld [vmem:[%s3891_s3 + $0x20] sm:$0xff]  ;;  %v2694_v51 = vpack.c.bf16 %v1111_v49, %v1110_v48  ;;  %v1063_v52 = vld [vmem:[%s3891_s3 + $0x28] sm:$0xff]  ;;  %v1081_v57 = vld [vmem:[%s3891_s3 + $0xb8] sm:$0xff] }
  0x4e   : > { %v1094_v53 = vld [vmem:[%s3891_s3 + $0x120] sm:$0xff]  ;;  %v1095_v54 = vld [vmem:[%s3891_s3 + $0x128] sm:$0xff]  ;;  %v2664_v55 = vpack.c.bf16 %v1063_v52, %v1062_v50  ;;  %v1112_v58 = vld [vmem:[%s3891_s3 + $0x1b0] sm:$0xff]  ;;  %v2666_v60 = vpack.c.bf16 %v1081_v57, %v1080_v56 }
  0x4f   : > { %2661 = vmatpush3.bf16.msra.mxu0 %v2660_v42  ;;  %v2696_v59 = vpack.c.bf16 %v1095_v54, %v1094_v53  ;;  %v1113_v61 = vld [vmem:[%s3891_s3 + $0x1b8] sm:$0xff]  ;;  %v1064_v62 = vld [vmem:[%s3891_s3 + $0x30] sm:$0xff]  ;;  %v1082_v5 = vld [vmem:[%s3891_s3 + $0xc0] sm:$0xff] }
  0x50   : > { %2693 = vmatpush3.bf16.msra.mxu1 %v2692_v46  ;;  %2663 = vmatprep.subr.bf16.mxu0 %v2662_v47  ;;  %v1065_v63 = vld [vmem:[%s3891_s3 + $0x38] sm:$0xff]  ;;  %v2698_v0 = vpack.c.bf16 %v1113_v61, %v1112_v58  ;;  %v1096_v3 = vld [vmem:[%s3891_s3 + $0x130] sm:$0xff]  ;;  %v1083_v6 = vld [vmem:[%s3891_s3 + $0xc8] sm:$0xff] }
  0x51   : > { %2695 = vmatprep.subr.bf16.mxu1 %v2694_v51  ;;  %v1097_v4 = vld [vmem:[%s3891_s3 + $0x138] sm:$0xff]  ;;  %v1114_v7 = vld [vmem:[%s3891_s3 + $0x1c0] sm:$0xff]  ;;  %v1115_v8 = vld [vmem:[%s3891_s3 + $0x1c8] sm:$0xff]  ;;  %v2668_v9 = vpack.c.bf16 %v1065_v63, %v1064_v62  ;;  %v2670_v11 = vpack.c.bf16 %v1083_v6, %v1082_v5 }
  0x52   : > { %v2700_v10 = vpack.c.bf16 %v1097_v4, %v1096_v3  ;;  %v1066_v12 = vld [vmem:[%s3891_s3 + $0x40] sm:$0xff]  ;;  %v1067_v13 = vld [vmem:[%s3891_s3 + $0x48] sm:$0xff]  ;;  %v2702_v15 = vpack.c.bf16 %v1115_v8, %v1114_v7  ;;  %v1084_v17 = vld [vmem:[%s3891_s3 + $0xd0] sm:$0xff] }
  0x53   : > { %2665 = vmatpush3.bf16.msra.mxu0 %v2664_v55  ;;  %v1098_v14 = vld [vmem:[%s3891_s3 + $0x140] sm:$0xff]  ;;  %v1099_v16 = vld [vmem:[%s3891_s3 + $0x148] sm:$0xff]  ;;  %v1085_v18 = vld [vmem:[%s3891_s3 + $0xd8] sm:$0xff]  ;;  %v2672_v21 = vpack.c.bf16 %v1067_v13, %v1066_v12 }
  0x54   : > { %2697 = vmatpush3.bf16.msra.mxu1 %v2696_v59  ;;  %2667 = vmatprep.subr.bf16.mxu0 %v2666_v60  ;;  %v1116_v19 = vld [vmem:[%s3891_s3 + $0x1d0] sm:$0xff]  ;;  %v1117_v20 = vld [vmem:[%s3891_s3 + $0x1d8] sm:$0xff]  ;;  %v2704_v22 = vpack.c.bf16 %v1099_v16, %v1098_v14  ;;  %v2674_v1 = vpack.c.bf16 %v1085_v18, %v1084_v17  ;;  %v1086_v27 = vld [vmem:[%s3891_s3 + $0xe0] sm:$0xff] }
  0x55   : > { %2699 = vmatprep.subr.bf16.mxu1 %v2698_v0  ;;  %v1068_v2 = vld [vmem:[%s3891_s3 + $0x50] sm:$0xff]  ;;  %v1069_v23 = vld [vmem:[%s3891_s3 + $0x58] sm:$0xff]  ;;  %v2706_v25 = vpack.c.bf16 %v1117_v20, %v1116_v19  ;;  %v1087_v28 = vld [vmem:[%s3891_s3 + $0xe8] sm:$0xff] }
  0x56   : > { %v1100_v24 = vld [vmem:[%s3891_s3 + $0x150] sm:$0xff]  ;;  %v1101_v26 = vld [vmem:[%s3891_s3 + $0x158] sm:$0xff]  ;;  %v1118_v29 = vld [vmem:[%s3891_s3 + $0x1e0] sm:$0xff]  ;;  %v2676_v31 = vpack.c.bf16 %v1069_v23, %v1068_v2  ;;  %v2678_v35 = vpack.c.bf16 %v1087_v28, %v1086_v27 }
  0x57   : > { %2669 = vmatpush3.bf16.msra.mxu0 %v2668_v9  ;;  %v1119_v30 = vld [vmem:[%s3891_s3 + $0x1e8] sm:$0xff]  ;;  %v1070_v32 = vld [vmem:[%s3891_s3 + $0x60] sm:$0xff]  ;;  %v2708_v34 = vpack.c.bf16 %v1101_v26, %v1100_v24  ;;  %v3290_v38 = vld [vmem:[#allocation2 + $0x18] sm:$0xff] }
  0x58   : > { %2701 = vmatpush3.bf16.msra.mxu1 %v2700_v10  ;;  %2671 = vmatprep.subr.bf16.mxu0 %v2670_v11  ;;  %v1071_v33 = vld [vmem:[%s3891_s3 + $0x68] sm:$0xff]  ;;  %v1102_v36 = vld [vmem:[%s3891_s3 + $0x160] sm:$0xff]  ;;  %v2710_v39 = vpack.c.bf16 %v1119_v30, %v1118_v29  ;;  %v1088_v41 = vld [vmem:[%s3891_s3 + $0xf0] sm:$0xff] }
  0x59   : > { %2703 = vmatprep.subr.bf16.mxu1 %v2702_v15  ;;  %v657_v37 = vld [vmem:[#allocation2 + $0x1] sm:$0xff]  ;;  %v1089_v42 = vld [vmem:[%s3891_s3 + $0xf8] sm:$0xff]  ;;  %v1120_v43 = vld [vmem:[%s3891_s3 + $0x1f0] sm:$0xff]  ;;  %1411 = vmatprep.mubr.f32.mxu1 %v3290_v38  ;;  %v2680_v45 = vpack.c.bf16 %v1071_v33, %v1070_v32 }
  0x5a   : > { %v1103_v40 = vld [vmem:[%s3891_s3 + $0x168] sm:$0xff]  ;;  %1266 = vmatprep.mubr.f32.mxu0 %v657_v37  ;;  %v1121_v44 = vld [vmem:[%s3891_s3 + $0x1f8] sm:$0xff]  ;;  %v2682_v47 = vpack.c.bf16 %v1089_v42, %v1088_v41  ;;  %v1072_v48 = vld [vmem:[%s3891_s3 + $0x70] sm:$0xff] }
  0x5b   : > { %2673 = vmatpush3.bf16.msra.mxu0 %v2672_v21  ;;  %v2712_v46 = vpack.c.bf16 %v1103_v40, %v1102_v36  ;;  %v1073_v49 = vld [vmem:[%s3891_s3 + $0x78] sm:$0xff]  ;;  %v1104_v50 = vld [vmem:[%s3891_s3 + $0x170] sm:$0xff]  ;;  %v2714_v51 = vpack.c.bf16 %v1121_v44, %v1120_v43  ;;  %v1138_v53 = vld [vmem:[%s3891_s3 + $0x280] sm:$0xff] }
  0x5c   : > { %2705 = vmatpush3.bf16.msra.mxu1 %v2704_v22  ;;  %2675 = vmatprep.subr.bf16.mxu0 %v2674_v1  ;;  %v1105_v52 = vld [vmem:[%s3891_s3 + $0x178] sm:$0xff]  ;;  %v1139_v54 = vld [vmem:[%s3891_s3 + $0x288] sm:$0xff]  ;;  %v2684_v55 = vpack.c.bf16 %v1073_v49, %v1072_v48  ;;  %v1122_v58 = vld [vmem:[%s3891_s3 + $0x200] sm:$0xff] }
  0x5d   : > { %2707 = vmatprep.subr.bf16.mxu1 %v2706_v25  ;;  %v2716_v56 = vpack.c.bf16 %v1105_v52, %v1104_v50  ;;  %v2718_v57 = vpack.c.bf16 %v1139_v54, %v1138_v53  ;;  %v1123_v59 = vld [vmem:[%s3891_s3 + $0x208] sm:$0xff]  ;;  %v1170_v60 = vld [vmem:[%s3891_s3 + $0x380] sm:$0xff]  ;;  %v1140_v62 = vld [vmem:[%s3891_s3 + $0x290] sm:$0xff] }
  0x5e   : > { %v1171_v61 = vld [vmem:[%s3891_s3 + $0x388] sm:$0xff]  ;;  %v1141_v63 = vld [vmem:[%s3891_s3 + $0x298] sm:$0xff]  ;;  %v1154_v3 = vld [vmem:[%s3891_s3 + $0x300] sm:$0xff]  ;;  %v2720_v5 = vpack.c.bf16 %v1123_v59, %v1122_v58 }
  0x5f   : > { %2677 = vmatpush3.bf16.msra.mxu0 %v2676_v31  ;;  %v2750_v0 = vpack.c.bf16 %v1171_v61, %v1170_v60  ;;  %v625_v4 = vld [vmem:[#allocation2] sm:$0xff]  ;;  %v1155_v6 = vld [vmem:[%s3891_s3 + $0x308] sm:$0xff]  ;;  %v2722_v10 = vpack.c.bf16 %v1141_v63, %v1140_v62  ;;  %v1124_v11 = vld [vmem:[%s3891_s3 + $0x210] sm:$0xff] }
  0x60   : > { %2709 = vmatpush3.bf16.msra.mxu1 %v2708_v34  ;;  %2679 = vmatprep.subr.bf16.mxu0 %v2678_v35  ;;  %v689_v7 = vld [vmem:[#allocation2 + $0x2] sm:$0xff]  ;;  %v1125_v12 = vld [vmem:[%s3891_s3 + $0x218] sm:$0xff]  ;;  %v2752_v14 = vpack.c.bf16 %v1155_v6, %v1154_v3  ;;  %v1172_v16 = vld [vmem:[%s3891_s3 + $0x390] sm:$0xff] }
  0x61   : > { %2711 = vmatprep.subr.bf16.mxu1 %v2710_v39  ;;  %v658_v8 = vld [vmem:[#allocation2 + $0x9] sm:$0xff]  ;;  %v3350_v9 = vld [vmem:[#allocation2 + $0x20] sm:$0xff]  ;;  %v1173_v17 = vld [vmem:[%s3891_s3 + $0x398] sm:$0xff]  ;;  %v2724_v2 = vpack.c.bf16 %v1125_v12, %v1124_v11 }
  0x62   : > { %v1142_v13 = vld [vmem:[%s3891_s3 + $0x2a0] sm:$0xff]  ;;  %v1143_v15 = vld [vmem:[%s3891_s3 + $0x2a8] sm:$0xff]  ;;  %v2754_v19 = vpack.c.bf16 %v1173_v17, %v1172_v16  ;;  %v1156_v20 = vld [vmem:[%s3891_s3 + $0x310] sm:$0xff] }
  0x63   : > { %2681 = vmatpush3.bf16.msra.mxu0 %v2680_v45  ;;  %v626_v18 = vld [vmem:[#allocation2 + $0x8] sm:$0xff]  ;;  %v1157_v21 = vld [vmem:[%s3891_s3 + $0x318] sm:$0xff]  ;;  %v3379_v23 = vld [vmem:[#allocation2 + $0x30] sm:$0xff]  ;;  %v2726_v24 = vpack.c.bf16 %v1143_v15, %v1142_v13 }
  0x64   : > { %2713 = vmatpush3.bf16.msra.mxu1 %v2712_v46  ;;  %2683 = vmatprep.subr.bf16.mxu0 %v2682_v47  ;;  %v690_v22 = vld [vmem:[#allocation2 + $0xa] sm:$0xff]  ;;  %v3377_v1 = vld [vmem:[#allocation2 + $0x19] sm:$0xff]  ;;  %v2756_v27 = vpack.c.bf16 %v1157_v21, %v1156_v20  ;;  %v3403_v33 = vld [vmem:[#allocation2 + $0x21] sm:$0xff] }
  0x65   : > { %2715 = vmatprep.subr.bf16.mxu1 %v2714_v51  ;;  %v1126_v25 = vld [vmem:[%s3891_s3 + $0x220] sm:$0xff]  ;;  %v1127_v26 = vld [vmem:[%s3891_s3 + $0x228] sm:$0xff]  ;;  %v1144_v28 = vld [vmem:[%s3891_s3 + $0x2b0] sm:$0xff] }
  0x66   : > { %v1145_v29 = vld [vmem:[%s3891_s3 + $0x2b8] sm:$0xff]  ;;  %v1174_v30 = vld [vmem:[%s3891_s3 + $0x3a0] sm:$0xff]  ;;  %v1175_v32 = vld [vmem:[%s3891_s3 + $0x3a8] sm:$0xff]  ;;  %v2728_v34 = vpack.c.bf16 %v1127_v26, %v1126_v25 }
  0x67   : > { %2685 = vmatpush3.bf16.msra.mxu0 %v2684_v55  ;;  %v3397_v31 = vld [vmem:[#allocation2 + $0x1a] sm:$0xff]  ;;  %v2758_v35 = vpack.c.bf16 %v1175_v32, %v1174_v30  ;;  %v1159_v37 = vld [vmem:[%s3891_s3 + $0x328] sm:$0xff]  ;;  %v2730_v40 = vpack.c.bf16 %v1145_v29, %v1144_v28  ;;  %v1128_v41 = vld [vmem:[%s3891_s3 + $0x230] sm:$0xff] }
  0x68   : > { %2717 = vmatpush3.bf16.msra.mxu1 %v2716_v56  ;;  %2719 = vmatprep.subr.bf16.mxu0 %v2718_v57  ;;  %v1158_v36 = vld [vmem:[%s3891_s3 + $0x320] sm:$0xff]  ;;  %v3411_v39 = vld [vmem:[#allocation2 + $0x38] sm:$0xff]  ;;  %v1147_v45 = vld [vmem:[%s3891_s3 + $0x2c8] sm:$0xff] }
  0x69   : > { %2751 = vmatprep.subr.bf16.mxu1 %v2750_v0  ;;  %v1129_v42 = vld [vmem:[%s3891_s3 + $0x238] sm:$0xff]  ;;  %v2760_v43 = vpack.c.bf16 %v1159_v37, %v1158_v36  ;;  %v1146_v44 = vld [vmem:[%s3891_s3 + $0x2c0] sm:$0xff]  ;;  %v1176_v47 = vld [vmem:[%s3891_s3 + $0x3b0] sm:$0xff] }
  0x6a   : > { %1267 = vmatmul.mubr.f32.vlgmr.msra.gmra.mrb[0].mxu0 %v625_v4  ;;  %v3428_v46 = vld [vmem:[#allocation2 + $0x22] sm:$0xff]  ;;  %v3437_v48 = vld [vmem:[#allocation2 + $0x31] sm:$0xff]  ;;  %v2732_v50 = vpack.c.bf16 %v1129_v42, %v1128_v41  ;;  %v2734_v53 = vpack.c.bf16 %v1147_v45, %v1146_v44  ;;  %v3464_v61 = vld [vmem:[#allocation2 + $0x39] sm:$0xff] }
  0x6b   : > { %1412 = vmatmul.mubr.f32.vlgmr.msra.gmra.mrb[0].mxu1 %v689_v7  ;;  %2721 = vmatpush3.bf16.msra.mxu0 %v2720_v5  ;;  %v3439_v49 = vld [vmem:[#allocation2 + $0x48] sm:$0xff]  ;;  %v1160_v52 = vld [vmem:[%s3891_s3 + $0x330] sm:$0xff]  ;;  %v1130_v54 = vld [vmem:[%s3891_s3 + $0x240] sm:$0xff] }
  0x6c   : > { %1271 = vmatprep.mubr.f32.mxu0 %v658_v8  ;;  %1416 = vmatprep.mubr.f32.mxu1 %v3350_v9  ;;  %v1131_v55 = vld [vmem:[%s3891_s3 + $0x248] sm:$0xff]  ;;  %v1161_v56 = vld [vmem:[%s3891_s3 + $0x338] sm:$0xff]  ;;  %v1148_v57 = vld [vmem:[%s3891_s3 + $0x2d0] sm:$0xff] }
  0x6d   : > { %2723 = vmatprep.subr.bf16.mxu0 %v2722_v10  ;;  %2753 = vmatpush3.bf16.msra.mxu1 %v2752_v14  ;;  %v1149_v58 = vld [vmem:[%s3891_s3 + $0x2d8] sm:$0xff]  ;;  %v2764_v59 = vpack.c.bf16 %v1161_v56, %v1160_v52  ;;  %v3466_v62 = vld [vmem:[#allocation2 + $0x50] sm:$0xff]  ;;  %v2736_v63 = vpack.c.bf16 %v1131_v55, %v1130_v54  ;;  %v1178_v3 = vld [vmem:[%s3891_s3 + $0x3c0] sm:$0xff] }
  0x6e   : > { %1272 = vmatmul.mubr.f32.gmra.mrb[2].mxu0 %v626_v18  ;;  %2755 = vmatprep.subr.bf16.mxu1 %v2754_v19  ;;  %v3462_v60 = vld [vmem:[#allocation2 + $0x32] sm:$0xff]  ;;  %v1179_v4 = vld [vmem:[%s3891_s3 + $0x3c8] sm:$0xff]  ;;  %v2738_v5 = vpack.c.bf16 %v1149_v58, %v1148_v57  ;;  %v1162_v8 = vld [vmem:[%s3891_s3 + $0x340] sm:$0xff] }
  0x6f   : > { %1417 = vmatmul.mubr.f32.gmra.mrb[2].mxu1 %v690_v22  ;;  %1276 = vmatprep.mubr.f32.mxu0 %v3377_v1  ;;  %v1132_v0 = vld [vmem:[%s3891_s3 + $0x250] sm:$0xff]  ;;  %v1133_v6 = vld [vmem:[%s3891_s3 + $0x258] sm:$0xff]  ;;  %v2766_v7 = vpack.c.bf16 %v1179_v4, %v1178_v3  ;;  %v1150_v11 = vld [vmem:[%s3891_s3 + $0x2e0] sm:$0xff] }
  0x70   : > { %1421 = vmatprep.mubr.f32.mxu1 %v3379_v23  ;;  %2725 = vmatpush3.bf16.msra.mxu0 %v2724_v2  ;;  %v3488_v10 = vld [vmem:[#allocation2 + $0x3a] sm:$0xff]  ;;  %v1151_v12 = vld [vmem:[%s3891_s3 + $0x2e8] sm:$0xff]  ;;  %v1180_v14 = vld [vmem:[%s3891_s3 + $0x3d0] sm:$0xff]  ;;  %v2740_v19 = vpack.c.bf16 %v1133_v6, %v1132_v0 }
  0x71   : > { %2727 = vmatprep.subr.bf16.mxu0 %v2726_v24  ;;  %2757 = vmatpush3.bf16.msra.mxu1 %v2756_v27  ;;  %v1181_v15 = vld [vmem:[%s3891_s3 + $0x3d8] sm:$0xff]  ;;  %v1164_v16 = vld [vmem:[%s3891_s3 + $0x350] sm:$0xff]  ;;  %v3510_v18 = vld [vmem:[#allocation2 + $0x60] sm:$0xff]  ;;  %v2742_v21 = vpack.c.bf16 %v1151_v12, %v1150_v11 }
  0x72   : > { %1277 = vmatmul.mubr.f32.gmra.mrb[4].mxu0 %v3290_v38  ;;  %2759 = vmatprep.subr.bf16.mxu1 %v2758_v35  ;;  %v1177_v38 = vld [vmem:[%s3891_s3 + $0x3b8] sm:$0xff]  ;;  %v3508_v17 = vld [vmem:[#allocation2 + $0x49] sm:$0xff]  ;;  %v1134_v22 = vld [vmem:[%s3891_s3 + $0x260] sm:$0xff]  ;;  %v2770_v24 = vpack.c.bf16 %v1181_v15, %v1180_v14 }
  0x73   : > { %1422 = vmatmul.mubr.f32.gmra.mrb[4].mxu1 %v3397_v31  ;;  %1281 = vmatprep.mubr.f32.mxu0 %v3403_v33  ;;  %v2762_v51 = vpack.c.bf16 %v1177_v38, %v1176_v47  ;;  %v1165_v20 = vld [vmem:[%s3891_s3 + $0x358] sm:$0xff]  ;;  %v1135_v2 = vld [vmem:[%s3891_s3 + $0x268] sm:$0xff]  ;;  %v1152_v25 = vld [vmem:[%s3891_s3 + $0x2f0] sm:$0xff] }
  0x74   : > { %1426 = vmatprep.mubr.f32.mxu1 %v3411_v39  ;;  %2729 = vmatpush3.bf16.msra.mxu0 %v2728_v34  ;;  %v2772_v26 = vpack.c.bf16 %v1165_v20, %v1164_v16  ;;  %v1153_v27 = vld [vmem:[%s3891_s3 + $0x2f8] sm:$0xff]  ;;  %v1182_v28 = vld [vmem:[%s3891_s3 + $0x3e0] sm:$0xff]  ;;  %v1183_v29 = vld [vmem:[%s3891_s3 + $0x3e8] sm:$0xff]  ;;  %v2744_v37 = vpack.c.bf16 %v1135_v2, %v1134_v22 }
  0x75   : > { %2731 = vmatprep.subr.bf16.mxu0 %v2730_v40  ;;  %2761 = vmatpush3.bf16.msra.mxu1 %v2760_v43  ;;  %v1166_v30 = vld [vmem:[%s3891_s3 + $0x360] sm:$0xff]  ;;  %v1167_v32 = vld [vmem:[%s3891_s3 + $0x368] sm:$0xff]  ;;  %v3545_v35 = vld [vmem:[#allocation2 + $0x51] sm:$0xff]  ;;  %v2746_v40 = vpack.c.bf16 %v1153_v27, %v1152_v25  ;;  %v2774_v41 = vpack.c.bf16 %v1183_v29, %v1182_v28 }
  0x76   : > { %1282 = vmatmul.mubr.f32.gmra.mrb[6].mxu0 %v3350_v9  ;;  %2763 = vmatprep.subr.bf16.mxu1 %v2762_v51  ;;  %v1163_v9 = vld [vmem:[%s3891_s3 + $0x348] sm:$0xff]  ;;  %v1136_v42 = vld [vmem:[%s3891_s3 + $0x270] sm:$0xff]  ;;  %v1137_v43 = vld [vmem:[%s3891_s3 + $0x278] sm:$0xff]  ;;  %v2776_v45 = vpack.c.bf16 %v1167_v32, %v1166_v30 }
  0x77   : > { %1427 = vmatmul.mubr.f32.gmra.mrb[6].mxu1 %v3428_v46  ;;  %1286 = vmatprep.mubr.f32.mxu0 %v3437_v48  ;;  %v2768_v13 = vpack.c.bf16 %v1163_v9, %v1162_v8  ;;  %v3543_v34 = vld [vmem:[#allocation2 + $0x4a] sm:$0xff]  ;;  %v1185_v47 = vld [vmem:[%s3891_s3 + $0x3f8] sm:$0xff]  ;;  %v1186_v38 = vld [vmem:[%s3891_s3 + $0x400] sm:$0xff]  ;;  %v2748_v55 = vpack.c.bf16 %v1137_v43, %v1136_v42 }
  0x78   : > { %1431 = vmatprep.mubr.f32.mxu1 %v3439_v49  ;;  %2733 = vmatpush3.bf16.msra.mxu0 %v2732_v50  ;;  %v3547_v36 = vld [vmem:[#allocation2 + $0x68] sm:$0xff]  ;;  %v1184_v44 = vld [vmem:[%s3891_s3 + $0x3f0] sm:$0xff]  ;;  %v1169_v52 = vld [vmem:[%s3891_s3 + $0x378] sm:$0xff] }
  0x79   : > { %2735 = vmatprep.subr.bf16.mxu0 %v2734_v53  ;;  %2765 = vmatpush3.bf16.msra.mxu1 %v2764_v59  ;;  %v1187_v50 = vld [vmem:[%s3891_s3 + $0x408] sm:$0xff]  ;;  %v1168_v51 = vld [vmem:[%s3891_s3 + $0x370] sm:$0xff]  ;;  %v3581_v56 = vld [vmem:[#allocation2 + $0x78] sm:$0xff]  ;;  %v2778_v57 = vpack.c.bf16 %v1185_v47, %v1184_v44 }
  0x7a   : > { %1287 = vmatmul.mubr.f32.gmra.mrb[8].mxu0 %v3379_v23  ;;  %2767 = vmatprep.subr.bf16.mxu1 %v2766_v7  ;;  %v3577_v53 = vld [vmem:[#allocation2 + $0x52] sm:$0xff]  ;;  %v3579_v54 = vld [vmem:[#allocation2 + $0x61] sm:$0xff]  ;;  %v3583_v58 = vpack.c.bf16 %v1187_v50, %v1186_v38  ;;  %v2780_v59 = vpack.c.bf16 %v1169_v52, %v1168_v51  ;;  %v3591_v0 = vld [vmem:[#allocation2 + $0x69] sm:$0xff] }
  0x7b   : > { %1432 = vmatmul.mubr.f32.gmra.mrb[8].mxu1 %v3462_v60  ;;  %1291 = vmatprep.mubr.f32.mxu0 %v3464_v61  ;;  %v3593_v3 = vld [vmem:[#allocation2 + $0x80] sm:$0xff]  ;;  %v3600_v4 = vld [vmem:[#allocation2 + $0x6a] sm:$0xff]  ;;  %v3615_v9 = vld [vmem:[#allocation2 + $0x98] sm:$0xff] }
  0x7c   : > { %1436 = vmatprep.mubr.f32.mxu1 %v3466_v62  ;;  %2737 = vmatpush3.bf16.msra.mxu0 %v2736_v63  ;;  %v3589_v63 = vld [vmem:[#allocation2 + $0x62] sm:$0xff]  ;;  %v3605_v6 = vld [vmem:[#allocation2 + $0x90] sm:$0xff]  ;;  %v3611_v7 = vld [vmem:[#allocation2 + $0x7a] sm:$0xff] }
  0x7d   : > { %2739 = vmatprep.subr.bf16.mxu0 %v2738_v5  ;;  %2769 = vmatpush3.bf16.msra.mxu1 %v2768_v13  ;;  %v3602_v5 = vld [vmem:[#allocation2 + $0x79] sm:$0xff]  ;;  %v3613_v8 = vld [vmem:[#allocation2 + $0x81] sm:$0xff]  ;;  %v3623_v12 = vld [vmem:[#allocation2 + $0x91] sm:$0xff] }
  0x7e   : > { %1292 = vmatmul.mubr.f32.gmra.mrb[10].mxu0 %v3411_v39  ;;  %2771 = vmatprep.subr.bf16.mxu1 %v2770_v24  ;;  %v3621_v11 = vld [vmem:[#allocation2 + $0x82] sm:$0xff]  ;;  %v3631_v14 = vld [vmem:[#allocation2 + $0x92] sm:$0xff]  ;;  %v3651_v22 = vld [vmem:[#allocation2 + $0xaa] sm:$0xff] }
  0x7f   : > { %1437 = vmatmul.mubr.f32.gmra.mrb[10].mxu1 %v3488_v10  ;;  %1296 = vmatprep.mubr.f32.mxu0 %v3508_v17  ;;  %v3625_v13 = vld [vmem:[#allocation2 + $0xa8] sm:$0xff]  ;;  %v3633_v15 = vld [vmem:[#allocation2 + $0x99] sm:$0xff]  ;;  %v3635_v16 = vld [vmem:[#allocation2 + $0xb0] sm:$0xff] }
  0x80   : > { %1441 = vmatprep.mubr.f32.mxu1 %v3510_v18  ;;  %2741 = vmatpush3.bf16.msra.mxu0 %v2740_v19  ;;  %v3641_v19 = vld [vmem:[#allocation2 + $0x9a] sm:$0xff]  ;;  %v3643_v20 = vld [vmem:[#allocation2 + $0xa9] sm:$0xff]  ;;  %v3653_v2 = vld [vmem:[#allocation2 + $0xb1] sm:$0xff] }
  0x81   : > { %2743 = vmatprep.subr.bf16.mxu0 %v2742_v21  ;;  %2773 = vmatpush3.bf16.msra.mxu1 %v2772_v26  ;;  %v3645_v21 = vld [vmem:[#allocation2 + $0xc0] sm:$0xff]  ;;  %v3655_v24 = vld [vmem:[#allocation2 + $0xc8] sm:$0xff]  ;;  %v3661_v25 = vld [vmem:[#allocation2 + $0xb2] sm:$0xff] }
  0x82   : > { %1297 = vmatmul.mubr.f32.gmra.mrb[12].mxu0 %v3439_v49  ;;  %2775 = vmatprep.subr.bf16.mxu1 %v2774_v41  ;;  %v1188_v26 = vld [vmem:[%s3891_s3 + $0x410] sm:$0xff]  ;;  %v1189_v27 = vld [vmem:[%s3891_s3 + $0x418] sm:$0xff]  ;;  %v1190_v29 = vld [vmem:[%s3891_s3 + $0x420] sm:$0xff] }
  0x83   : > { %1442 = vmatmul.mubr.f32.gmra.mrb[12].mxu1 %v3543_v34  ;;  %1301 = vmatprep.mubr.f32.mxu0 %v3545_v35  ;;  %v2786_v28 = vpack.c.bf16 %v1189_v27, %v1188_v26  ;;  %v1191_v30 = vld [vmem:[%s3891_s3 + $0x428] sm:$0xff]  ;;  %v1201_v41 = vld [vmem:[%s3891_s3 + $0x478] sm:$0xff]  ;;  %v833_v38 = vld [vmem:[#allocation2 + $0xe0] sm:$0xff] }
  0x84   : > { %1446 = vmatprep.mubr.f32.mxu1 %v3547_v36  ;;  %2745 = vmatpush3.bf16.msra.mxu0 %v2744_v37  ;;  %v1195_v32 = vld [vmem:[%s3891_s3 + $0x448] sm:$0xff]  ;;  %v1197_v37 = vld [vmem:[%s3891_s3 + $0x458] sm:$0xff] }
  0x85   : > { %2747 = vmatprep.subr.bf16.mxu0 %v2746_v40  ;;  %2777 = vmatpush3.bf16.msra.mxu1 %v2776_v45  ;;  %v1199_v40 = vld [vmem:[%s3891_s3 + $0x468] sm:$0xff]  ;;  %v864_v43 = vld [vmem:[#allocation2 + $0xd9] sm:$0xff] }
  0x86   : > { %1302 = vmatmul.mubr.f32.gmra.mrb[14].mxu0 %v3466_v62  ;;  %2779 = vmatprep.subr.bf16.mxu1 %v2778_v57  ;;  %v799_v42 = vld [vmem:[#allocation2 + $0xc2] sm:$0xff]  ;;  %v832_v44 = vld [vmem:[#allocation2 + $0xd8] sm:$0xff]  ;;  %v800_v45 = vld [vmem:[#allocation2 + $0xca] sm:$0xff] }
  0x87   : > { %1447 = vmatmul.mubr.f32.gmra.mrb[14].mxu1 %v3577_v53  ;;  %1306 = vmatprep.mubr.f32.mxu0 %v3579_v54  ;;  %v865_v47 = vld [vmem:[#allocation2 + $0xe1] sm:$0xff] }
  0x88   : > { %1451 = vmatprep.mubr.f32.mxu1 %v3581_v56  ;;  %2749 = vmatpush3.bf16.msra.mxu0 %v2748_v55  ;;  %v896_v50 = vld [vmem:[#allocation2 + $0xda] sm:$0xff] }
  0x89   : > { %2783 = vmatprep.subr.bf16.mxu0 %v3583_v58  ;;  %2781 = vmatpush3.bf16.msra.mxu1 %v2780_v59 }
  0x8a   : > { %1307 = vmatmul.mubr.f32.gmra.mrb[16].mxu0 %v3510_v18  ;;  %2814 = vmatprep.subr.bf16.mxu1 %v3583_v58 }
  0x8b   : > { %1452 = vmatmul.mubr.f32.gmra.mrb[16].mxu1 %v3589_v63  ;;  %1311 = vmatprep.mubr.f32.mxu0 %v3591_v0 }
  0x8c   : > { %1456 = vmatprep.mubr.f32.mxu1 %v3593_v3 }
  0x8e   : > { %1312 = vmatmul.mubr.f32.gmra.mrb[18].mxu0 %v3547_v36 }
  0x8f   : > { %1457 = vmatmul.mubr.f32.gmra.mrb[18].mxu1 %v3600_v4  ;;  %1316 = vmatprep.mubr.f32.mxu0 %v3602_v5 }
  0x90   : > { %1461 = vmatprep.mubr.f32.mxu1 %v3605_v6 }
  0x92   : > { %1317 = vmatmul.mubr.f32.gmra.mrb[20].mxu0 %v3581_v56 }
  0x93   : > { %1462 = vmatmul.mubr.f32.gmra.mrb[20].mxu1 %v3611_v7  ;;  %1321 = vmatprep.mubr.f32.mxu0 %v3613_v8 }
  0x94   : > { %1466 = vmatprep.mubr.f32.mxu1 %v3615_v9 }
  0x96   : > { %1322 = vmatmul.mubr.f32.gmra.mrb[22].mxu0 %v3593_v3 }
  0x97   : > { %1467 = vmatmul.mubr.f32.gmra.mrb[22].mxu1 %v3621_v11  ;;  %1326 = vmatprep.mubr.f32.mxu0 %v3623_v12 }
  0x98   : > { %1471 = vmatprep.mubr.f32.mxu1 %v3625_v13 }
  0x9a   : > { %1327 = vmatmul.mubr.f32.gmra.mrb[24].mxu0 %v3605_v6 }
  0x9b   : > { %1472 = vmatmul.mubr.f32.gmra.mrb[24].mxu1 %v3631_v14  ;;  %1331 = vmatprep.mubr.f32.mxu0 %v3633_v15 }
  0x9c   : > { %1476 = vmatprep.mubr.f32.mxu1 %v3635_v16 }
  0x9e   : > { %1332 = vmatmul.mubr.f32.gmra.mrb[26].mxu0 %v3615_v9 }
  0x9f   : > { %1477 = vmatmul.mubr.f32.gmra.mrb[26].mxu1 %v3641_v19  ;;  %1336 = vmatprep.mubr.f32.mxu0 %v3643_v20 }
  0xa0   : > { %1481 = vmatprep.mubr.f32.mxu1 %v3645_v21 }
  0xa2   : > { %1337 = vmatmul.mubr.f32.gmra.mrb[28].mxu0 %v3625_v13 }
  0xa3   : > { %1482 = vmatmul.mubr.f32.gmra.mrb[28].mxu1 %v3651_v22  ;;  %1341 = vmatprep.mubr.f32.mxu0 %v3653_v2 }
  0xa4   : > { %1486 = vmatprep.mubr.f32.mxu1 %v3655_v24 }
  0xa6   : > { %1342 = vmatmul.mubr.f32.gmra.mrb[30].mxu0 %v3635_v16 }
  0xa7   : > { %1487 = vmatmul.mubr.f32.gmra.mrb[30].mxu1 %v3661_v25  ;;  %1556 = vmatprep.mubr.f32.mxu0 %v3397_v31  ;;  %v2790_v31 = vpack.c.bf16 %v1191_v30, %v1190_v29 }
  0xa8   : > { %1701 = vmatprep.mubr.f32.mxu1 %v3437_v48 }
  0xaa   : > { %1557 = vmatmul.mubr.f32.vlgmr.msra.gmra.mrb[32].mxu0 %v3377_v1  ;;  %v1192_v1 = vld [vmem:[%s3891_s3 + $0x430] sm:$0xff] }
  0xab   : > { %1702 = vmatmul.mubr.f32.vlgmr.msra.gmra.mrb[32].mxu1 %v3379_v23  ;;  %2785 = vmatpush3.bf16.msra.mxu0 %v3583_v58  ;;  %v1193_v23 = vld [vmem:[%s3891_s3 + $0x438] sm:$0xff] }
  0xac   : > { %1561 = vmatprep.mubr.f32.mxu0 %v3428_v46  ;;  %1706 = vmatprep.mubr.f32.mxu1 %v3464_v61  ;;  %v2794_v46 = vpack.c.bf16 %v1193_v23, %v1192_v1 }
  0xad   : > { %2787 = vmatprep.subr.bf16.mxu0 %v2786_v28  ;;  %2822 = vmatpush3.bf16.msra.mxu1 %v3583_v58 }
  0xae   : > { %1562 = vmatmul.mubr.f32.gmra.mrb[34].mxu0 %v3403_v33  ;;  %2815 = vmatprep.subr.bf16.mxu1 %v2786_v28  ;;  %v1194_v33 = vld [vmem:[%s3891_s3 + $0x440] sm:$0xff] }
  0xaf   : > { %1707 = vmatmul.mubr.f32.gmra.mrb[34].mxu1 %v3411_v39  ;;  %1566 = vmatprep.mubr.f32.mxu0 %v3462_v60  ;;  %v2798_v39 = vpack.c.bf16 %v1195_v32, %v1194_v33 }
  0xb0   : > { %1711 = vmatprep.mubr.f32.mxu1 %v3508_v17  ;;  %2789 = vmatpush3.bf16.msra.mxu0 %v2786_v28 }
  0xb1   : > { %2791 = vmatprep.subr.bf16.mxu0 %v2790_v31  ;;  %2823 = vmatpush3.bf16.msra.mxu1 %v2786_v28 }
  0xb2   : > { %1567 = vmatmul.mubr.f32.gmra.mrb[36].mxu0 %v3437_v48  ;;  %2816 = vmatprep.subr.bf16.mxu1 %v2790_v31  ;;  %v1196_v48 = vld [vmem:[%s3891_s3 + $0x450] sm:$0xff] }
  0xb3   : > { %1712 = vmatmul.mubr.f32.gmra.mrb[36].mxu1 %v3439_v49  ;;  %1571 = vmatprep.mubr.f32.mxu0 %v3488_v10  ;;  %v2802_v49 = vpack.c.bf16 %v1197_v37, %v1196_v48 }
  0xb4   : > { %1716 = vmatprep.mubr.f32.mxu1 %v3545_v35  ;;  %2793 = vmatpush3.bf16.msra.mxu0 %v2790_v31 }
  0xb5   : > { %2795 = vmatprep.subr.bf16.mxu0 %v2794_v46  ;;  %2824 = vmatpush3.bf16.msra.mxu1 %v2790_v31 }
  0xb6   : > { %1572 = vmatmul.mubr.f32.gmra.mrb[38].mxu0 %v3464_v61  ;;  %2817 = vmatprep.subr.bf16.mxu1 %v2794_v46  ;;  %v1198_v61 = vld [vmem:[%s3891_s3 + $0x460] sm:$0xff] }
  0xb7   : > { %1717 = vmatmul.mubr.f32.gmra.mrb[38].mxu1 %v3466_v62  ;;  %1576 = vmatprep.mubr.f32.mxu0 %v3543_v34  ;;  %v2806_v62 = vpack.c.bf16 %v1199_v40, %v1198_v61 }
  0xb8   : > { %1721 = vmatprep.mubr.f32.mxu1 %v3579_v54  ;;  %2797 = vmatpush3.bf16.msra.mxu0 %v2794_v46 }
  0xb9   : > { %2799 = vmatprep.subr.bf16.mxu0 %v2798_v39  ;;  %2825 = vmatpush3.bf16.msra.mxu1 %v2794_v46 }
  0xba   : > { %1577 = vmatmul.mubr.f32.gmra.mrb[40].mxu0 %v3508_v17  ;;  %2818 = vmatprep.subr.bf16.mxu1 %v2798_v39  ;;  %v1200_v17 = vld [vmem:[%s3891_s3 + $0x470] sm:$0xff] }
  0xbb   : > { %1722 = vmatmul.mubr.f32.gmra.mrb[40].mxu1 %v3510_v18  ;;  %1581 = vmatprep.mubr.f32.mxu0 %v3577_v53  ;;  %v2810_v18 = vpack.c.bf16 %v1201_v41, %v1200_v17 }
  0xbc   : > { %1726 = vmatprep.mubr.f32.mxu1 %v3591_v0  ;;  %2801 = vmatpush3.bf16.msra.mxu0 %v2798_v39 }
  0xbd   : > { %2803 = vmatprep.subr.bf16.mxu0 %v2802_v49  ;;  %2826 = vmatpush3.bf16.msra.mxu1 %v2798_v39 }
  0xbe   : > { %1582 = vmatmul.mubr.f32.gmra.mrb[42].mxu0 %v3545_v35  ;;  %2819 = vmatprep.subr.bf16.mxu1 %v2802_v49  ;;  %v862_v35 = vld [vmem:[#allocation2 + $0xc1] sm:$0xff] }
  0xbf   : > { %1727 = vmatmul.mubr.f32.gmra.mrb[42].mxu1 %v3547_v36  ;;  %1586 = vmatprep.mubr.f32.mxu0 %v3589_v63  ;;  %v863_v36 = vld [vmem:[#allocation2 + $0xc9] sm:$0xff] }
  0xc0   : > { %1731 = vmatprep.mubr.f32.mxu1 %v3602_v5  ;;  %2805 = vmatpush3.bf16.msra.mxu0 %v2802_v49 }
  0xc1   : > { %2807 = vmatprep.subr.bf16.mxu0 %v2806_v62  ;;  %2827 = vmatpush3.bf16.msra.mxu1 %v2802_v49 }
  0xc2   : > { %1587 = vmatmul.mubr.f32.gmra.mrb[44].mxu0 %v3579_v54  ;;  %2820 = vmatprep.subr.bf16.mxu1 %v2806_v62 }
  0xc3   : > { %1732 = vmatmul.mubr.f32.gmra.mrb[44].mxu1 %v3581_v56  ;;  %1591 = vmatprep.mubr.f32.mxu0 %v3600_v4 }
  0xc4   : > { %1736 = vmatprep.mubr.f32.mxu1 %v3613_v8  ;;  %2809 = vmatpush3.bf16.msra.mxu0 %v2806_v62 }
  0xc5   : > { %2811 = vmatprep.subr.bf16.mxu0 %v2810_v18  ;;  %2828 = vmatpush3.bf16.msra.mxu1 %v2806_v62 }
  0xc6   : > { %1592 = vmatmul.mubr.f32.gmra.mrb[46].mxu0 %v3591_v0  ;;  %2821 = vmatprep.subr.bf16.mxu1 %v2810_v18 }
  0xc7   : > { %1737 = vmatmul.mubr.f32.gmra.mrb[46].mxu1 %v3593_v3  ;;  %1596 = vmatprep.mubr.f32.mxu0 %v3611_v7 }
  0xc8   : > { %1741 = vmatprep.mubr.f32.mxu1 %v3623_v12  ;;  %2813 = vmatpush3.bf16.msra.mxu0 %v2810_v18 }
  0xc9   : > { %2829 = vmatpush3.bf16.msra.mxu1 %v2810_v18 }
  0xca   : > { %1597 = vmatmul.mubr.f32.gmra.mrb[48].mxu0 %v3602_v5 }
  0xcb   : > { %1742 = vmatmul.mubr.f32.gmra.mrb[48].mxu1 %v3605_v6  ;;  %1601 = vmatprep.mubr.f32.mxu0 %v3621_v11 }
  0xcc   : > { %1746 = vmatprep.mubr.f32.mxu1 %v3633_v15 }
  0xce   : > { %1602 = vmatmul.mubr.f32.gmra.mrb[50].mxu0 %v3613_v8 }
  0xcf   : > { %1747 = vmatmul.mubr.f32.gmra.mrb[50].mxu1 %v3615_v9  ;;  %1606 = vmatprep.mubr.f32.mxu0 %v3631_v14 }
  0xd0   : > { %1751 = vmatprep.mubr.f32.mxu1 %v3643_v20 }
  0xd2   : > { %1607 = vmatmul.mubr.f32.gmra.mrb[52].mxu0 %v3623_v12 }
  0xd3   : > { %1752 = vmatmul.mubr.f32.gmra.mrb[52].mxu1 %v3625_v13  ;;  %1611 = vmatprep.mubr.f32.mxu0 %v3641_v19 }
  0xd4   : > { %1756 = vmatprep.mubr.f32.mxu1 %v3653_v2 }
  0xd6   : > { %1612 = vmatmul.mubr.f32.gmra.mrb[54].mxu0 %v3633_v15 }
  0xd7   : > { %1757 = vmatmul.mubr.f32.gmra.mrb[54].mxu1 %v3635_v16  ;;  %1616 = vmatprep.mubr.f32.mxu0 %v3651_v22 }
  0xd8   : > { %1761 = vmatprep.mubr.f32.mxu1 %v862_v35 }
  0xda   : > { %1617 = vmatmul.mubr.f32.gmra.mrb[56].mxu0 %v3643_v20 }
  0xdb   : > { %1762 = vmatmul.mubr.f32.gmra.mrb[56].mxu1 %v3645_v21  ;;  %1621 = vmatprep.mubr.f32.mxu0 %v3661_v25 }
  0xdc   : > { %1766 = vmatprep.mubr.f32.mxu1 %v863_v36 }
  0xde   : > { %1622 = vmatmul.mubr.f32.gmra.mrb[58].mxu0 %v3653_v2 }
  0xdf   : > { %1767 = vmatmul.mubr.f32.gmra.mrb[58].mxu1 %v3655_v24  ;;  %1626 = vmatprep.mubr.f32.mxu0 %v799_v42 }
  0xe0   : > { %1771 = vmatprep.mubr.f32.mxu1 %v864_v43 }
  0xe2   : > { %1627 = vmatmul.mubr.f32.gmra.mrb[60].mxu0 %v862_v35 }
  0xe3   : > { %1772 = vmatmul.mubr.f32.gmra.mrb[60].mxu1 %v832_v44  ;;  %1631 = vmatprep.mubr.f32.mxu0 %v800_v45 }
  0xe4   : > { %1776 = vmatprep.mubr.f32.mxu1 %v865_v47 }
  0xe6   : > { %1632 = vmatmul.mubr.f32.gmra.mrb[62].mxu0 %v863_v36 }
  0xe7   : > { %1777 = vmatmul.mubr.f32.gmra.mrb[62].mxu1 %v833_v38  ;;  %2630 = vmatprep.mubr.f32.mxu0 %v3462_v60  ;;  %v897_v60 = vld [vmem:[#allocation2 + $0xe2] sm:$0xff] }
  0xe8   : > { %2642 = vmatprep.mubr.f32.mxu1 %v3631_v14 }
  0xea   : > { %2631 = vmatmul.mubr.f32.vlgmr.msra.gmra.mrb[64].mxu0 %v3488_v10 }
  0xeb   : > { %2643 = vmatmul.mubr.f32.vlgmr.msra.gmra.mrb[64].mxu1 %v3641_v19  ;;  %2633 = vmatprep.mubr.f32.mxu0 %v3543_v34 }
  0xec   : > { %2645 = vmatprep.mubr.f32.mxu1 %v3651_v22 }
  0xee   : > { %2634 = vmatmul.mubr.f32.gmra.mrb[66].mxu0 %v3577_v53 }
  0xef   : > { %2646 = vmatmul.mubr.f32.gmra.mrb[66].mxu1 %v3661_v25  ;;  %2636 = vmatprep.mubr.f32.mxu0 %v3589_v63 }
  0xf0   : > { %2648 = vmatprep.mubr.f32.mxu1 %v799_v42 }
  0xf2   : > { %2637 = vmatmul.mubr.f32.gmra.mrb[68].mxu0 %v3600_v4 }
  0xf3   : > { %2649 = vmatmul.mubr.f32.gmra.mrb[68].mxu1 %v800_v45  ;;  %2639 = vmatprep.mubr.f32.mxu0 %v3611_v7 }
  0xf4   : > { %2651 = vmatprep.mubr.f32.mxu1 %v896_v50 }
  0xf6   : > { %2640 = vmatmul.mubr.f32.gmra.mrb[70].mxu0 %v3621_v11 }
  0xf7   : > { %2652 = vmatmul.mubr.f32.gmra.mrb[70].mxu1 %v897_v60 }
 0x13d   : > { %v2278_v10 = vpop.f32.mrb[0].mxu0 }
 0x13e   : > { %v2358_v34 = vpop.f32.mrb[0].mxu1  ;;  %v2279_v51 = vpop.f32.mrb[1].mxu0 }
 0x13f   : > { %v2280_v52 = vadd.f32 %v2279_v51, %v2278_v10  ;;  %v2359_v53 = vpop.f32.mrb[1].mxu1 }
 0x140   : > { %v2360_v54 = vadd.f32 %v2359_v53, %v2358_v34 }
 0x141   : > { %v2281_v55 = vpop.f32.mrb[2].mxu0 }
 0x142   : > { %v3775_v56 = vadd.f32 %v2360_v54, %v2280_v52  ;;  %v2361_v57 = vpop.f32.mrb[2].mxu1  ;;  %v2282_v58 = vpop.f32.mrb[3].mxu0 }
 0x143   : > { %v2283_v59 = vadd.f32 %v2282_v58, %v2281_v55  ;;  %v2362_v63 = vpop.f32.mrb[3].mxu1 }
 0x144   : > { %v2363_v0 = vadd.f32 %v2362_v63, %v2361_v57 }
 0x145   : > { %v2284_v3 = vpop.f32.mrb[4].mxu0 }
 0x146   : > { %v3777_v4 = vadd.f32 %v2363_v0, %v2283_v59  ;;  %v2364_v5 = vpop.f32.mrb[4].mxu1  ;;  %v2285_v6 = vpop.f32.mrb[5].mxu0 }
 0x147   : > { %v2286_v7 = vadd.f32 %v2285_v6, %v2284_v3  ;;  %v2365_v8 = vpop.f32.mrb[5].mxu1 }
 0x148   : > { %v2366_v9 = vadd.f32 %v2365_v8, %v2364_v5 }
 0x149   : > { %v2287_v11 = vpop.f32.mrb[6].mxu0 }
 0x14a   : > { %v3779_v12 = vadd.f32 %v2366_v9, %v2286_v7  ;;  %v2367_v13 = vpop.f32.mrb[6].mxu1  ;;  %v2288_v14 = vpop.f32.mrb[7].mxu0 }
 0x14b   : > { %v2289_v15 = vadd.f32 %v2288_v14, %v2287_v11  ;;  %v2368_v16 = vpop.f32.mrb[7].mxu1 }
 0x14c   : > { %v2369_v19 = vadd.f32 %v2368_v16, %v2367_v13 }
 0x14d   : > { %v2290_v20 = vpop.f32.mrb[8].mxu0 }
 0x14e   : > { %v3781_v21 = vadd.f32 %v2369_v19, %v2289_v15  ;;  %v2370_v22 = vpop.f32.mrb[8].mxu1  ;;  %v2291_v2 = vpop.f32.mrb[9].mxu0 }
 0x14f   : > { %v2292_v24 = vadd.f32 %v2291_v2, %v2290_v20  ;;  %v2371_v25 = vpop.f32.mrb[9].mxu1 }
 0x150   : > { %v2372_v26 = vadd.f32 %v2371_v25, %v2370_v22 }
 0x151   : > { %v2293_v27 = vpop.f32.mrb[10].mxu0 }
 0x152   : > { %v3783_v28 = vadd.f32 %v2372_v26, %v2292_v24  ;;  %v2373_v29 = vpop.f32.mrb[10].mxu1  ;;  %v2294_v30 = vpop.f32.mrb[11].mxu0 }
 0x153   : > { %v2295_v31 = vadd.f32 %v2294_v30, %v2293_v27  ;;  %v2374_v1 = vpop.f32.mrb[11].mxu1 }
 0x154   : > { %v2375_v23 = vadd.f32 %v2374_v1, %v2373_v29 }
 0x155   : > { %v2296_v46 = vpop.f32.mrb[12].mxu0 }
 0x156   : > { %v3785_v33 = vadd.f32 %v2375_v23, %v2295_v31  ;;  %v2376_v32 = vpop.f32.mrb[12].mxu1  ;;  %v2297_v39 = vpop.f32.mrb[13].mxu0 }
 0x157   : > { %v2298_v48 = vadd.f32 %v2297_v39, %v2296_v46  ;;  %v2377_v37 = vpop.f32.mrb[13].mxu1 }
 0x158   : > { %v2378_v49 = vadd.f32 %v2377_v37, %v2376_v32 }
 0x159   : > { %v2299_v61 = vpop.f32.mrb[14].mxu0 }
 0x15a   : > { %v3787_v40 = vadd.f32 %v2378_v49, %v2298_v48  ;;  %v2379_v62 = vpop.f32.mrb[14].mxu1  ;;  %v2300_v17 = vpop.f32.mrb[15].mxu0 }
 0x15b   : > { %v2301_v41 = vadd.f32 %v2300_v17, %v2299_v61  ;;  %v2380_v18 = vpop.f32.mrb[15].mxu1 }
 0x15c   : > { %v2381_v35 = vadd.f32 %v2380_v18, %v2379_v62 }
 0x15d   : > { %v2302_v36 = vpop.f32.mrb[16].mxu0 }
 0x15e   : > { %v3789_v42 = vadd.f32 %v2381_v35, %v2301_v41  ;;  %v2382_v43 = vpop.f32.mrb[16].mxu1  ;;  %v2303_v44 = vpop.f32.mrb[17].mxu0 }
 0x15f   : > { %v2304_v45 = vadd.f32 %v2303_v44, %v2302_v36  ;;  %v2383_v47 = vpop.f32.mrb[17].mxu1 }
 0x160   : > { %v2384_v38 = vadd.f32 %v2383_v47, %v2382_v43 }
 0x161   : > { %v2305_v50 = vpop.f32.mrb[18].mxu0 }
 0x162   : > { %v3791_v60 = vadd.f32 %v2384_v38, %v2304_v45  ;;  %v2385_v10 = vpop.f32.mrb[18].mxu1  ;;  %v2306_v34 = vpop.f32.mrb[19].mxu0 }
 0x163   : > { %v2307_v51 = vadd.f32 %v2306_v34, %v2305_v50  ;;  %v2386_v52 = vpop.f32.mrb[19].mxu1 }
 0x164   : > { %v2387_v53 = vadd.f32 %v2386_v52, %v2385_v10 }
 0x165   : > { %v2308_v54 = vpop.f32.mrb[20].mxu0 }
 0x166   : > { %v3793_v55 = vadd.f32 %v2387_v53, %v2307_v51  ;;  %v2388_v57 = vpop.f32.mrb[20].mxu1  ;;  %v2309_v58 = vpop.f32.mrb[21].mxu0 }
 0x167   : > { %v2310_v59 = vadd.f32 %v2309_v58, %v2308_v54  ;;  %v2389_v63 = vpop.f32.mrb[21].mxu1 }
 0x168   : > { %v2390_v0 = vadd.f32 %v2389_v63, %v2388_v57 }
 0x169   : > { %v2311_v3 = vpop.f32.mrb[22].mxu0 }
 0x16a   : > { %v3795_v5 = vadd.f32 %v2390_v0, %v2310_v59  ;;  %v2391_v6 = vpop.f32.mrb[22].mxu1  ;;  %v2312_v7 = vpop.f32.mrb[23].mxu0 }
 0x16b   : > { %v2313_v8 = vadd.f32 %v2312_v7, %v2311_v3  ;;  %v2392_v9 = vpop.f32.mrb[23].mxu1 }
 0x16c   : > { %v2393_v11 = vadd.f32 %v2392_v9, %v2391_v6 }
 0x16d   : > { %v2314_v13 = vpop.f32.mrb[24].mxu0 }
 0x16e   : > { %v3797_v14 = vadd.f32 %v2393_v11, %v2313_v8  ;;  %v2394_v15 = vpop.f32.mrb[24].mxu1  ;;  %v2315_v16 = vpop.f32.mrb[25].mxu0 }
 0x16f   : > { %v2316_v19 = vadd.f32 %v2315_v16, %v2314_v13  ;;  %v2395_v20 = vpop.f32.mrb[25].mxu1 }
 0x170   : > { %v2396_v22 = vadd.f32 %v2395_v20, %v2394_v15 }
 0x171   : > { %v2317_v2 = vpop.f32.mrb[26].mxu0 }
 0x172   : > { %v3799_v24 = vadd.f32 %v2396_v22, %v2316_v19  ;;  %v2397_v25 = vpop.f32.mrb[26].mxu1  ;;  %v2318_v26 = vpop.f32.mrb[27].mxu0 }
 0x173   : > { %v2319_v27 = vadd.f32 %v2318_v26, %v2317_v2  ;;  %v2398_v29 = vpop.f32.mrb[27].mxu1 }
 0x174   : > { %v2399_v30 = vadd.f32 %v2398_v29, %v2397_v25 }
 0x175   : > { %v2320_v31 = vpop.f32.mrb[28].mxu0 }
 0x176   : > { %v3801_v1 = vadd.f32 %v2399_v30, %v2319_v27  ;;  %v2400_v23 = vpop.f32.mrb[28].mxu1  ;;  %v2321_v46 = vpop.f32.mrb[29].mxu0 }
 0x177   : > { %v2322_v32 = vadd.f32 %v2321_v46, %v2320_v31  ;;  %v2401_v39 = vpop.f32.mrb[29].mxu1 }
 0x178   : > { %v2402_v48 = vadd.f32 %v2401_v39, %v2400_v23 }
 0x179   : > { %v2323_v37 = vpop.f32.mrb[30].mxu0 }
 0x17a   : > { %v3803_v49 = vadd.f32 %v2402_v48, %v2322_v32  ;;  %v2403_v61 = vpop.f32.mrb[30].mxu1  ;;  %v2324_v62 = vpop.f32.mrb[31].mxu0 }
 0x17b   : > { %v2325_v17 = vadd.f32 %v2324_v62, %v2323_v37  ;;  %v2404_v41 = vpop.f32.mrb[31].mxu1 }
 0x17c   : > { %v2405_v18 = vadd.f32 %v2404_v41, %v2403_v61 }
 0x17d   : > { %v2438_v35 = vpop.f32.mrb[32].mxu0 }
 0x17e   : > { %v3805_v36 = vadd.f32 %v2405_v18, %v2325_v17  ;;  %v2439_v43 = vpop.f32.mrb[33].mxu0  ;;  %v2518_v44 = vpop.f32.mrb[32].mxu1 }
 0x17f   : > { %v2440_v45 = vadd.f32 %v2439_v43, %v2438_v35  ;;  %v2519_v47 = vpop.f32.mrb[33].mxu1 }
 0x180   : > { %v2520_v38 = vadd.f32 %v2519_v47, %v2518_v44 }
 0x181   : > { %v1559_v50 = vadd.f32 %v2440_v45, %v3775_v56  ;;  %v2441_v10 = vpop.f32.mrb[34].mxu0 }
 0x182   : > { %v2442_v34 = vpop.f32.mrb[35].mxu0  ;;  %v2521_v51 = vpop.f32.mrb[34].mxu1 }
 0x183   : > { %v2443_v52 = vadd.f32 %v2442_v34, %v2441_v10  ;;  %v2522_v53 = vpop.f32.mrb[35].mxu1  ;;  %v3808_v54 = vadd.f32 %v2520_v38, %v1559_v50 }
 0x184   : > { %v2523_v57 = vadd.f32 %v2522_v53, %v2521_v51 }
 0x185   : > { %v1564_v58 = vadd.f32 %v2443_v52, %v3777_v4  ;;  %v2444_v59 = vpop.f32.mrb[36].mxu0 }
 0x186   : > { %v2445_v63 = vpop.f32.mrb[37].mxu0  ;;  %v2524_v0 = vpop.f32.mrb[36].mxu1 }
 0x187   : > { %v2446_v3 = vadd.f32 %v2445_v63, %v2444_v59  ;;  %v2525_v6 = vpop.f32.mrb[37].mxu1  ;;  %v3811_v7 = vadd.f32 %v2523_v57, %v1564_v58 }
 0x188   : > { %v2526_v8 = vadd.f32 %v2525_v6, %v2524_v0 }
 0x189   : > { %v1569_v56 = vadd.f32 %v2446_v3, %v3779_v12  ;;  %v2447_v9 = vpop.f32.mrb[38].mxu0 }
 0x18a   : > { %v2448_v11 = vpop.f32.mrb[39].mxu0  ;;  %v2527_v13 = vpop.f32.mrb[38].mxu1 }
 0x18b   : > { %v2449_v15 = vadd.f32 %v2448_v11, %v2447_v9  ;;  %v2528_v16 = vpop.f32.mrb[39].mxu1  ;;  %v3814_v19 = vadd.f32 %v2526_v8, %v1569_v56 }
 0x18c   : > { %v2529_v20 = vadd.f32 %v2528_v16, %v2527_v13 }
 0x18d   : > { %v1574_v4 = vadd.f32 %v2449_v15, %v3781_v21  ;;  %v2450_v22 = vpop.f32.mrb[40].mxu0 }
 0x18e   : > { %v2451_v2 = vpop.f32.mrb[41].mxu0  ;;  %v2530_v25 = vpop.f32.mrb[40].mxu1 }
 0x18f   : > { %v2452_v26 = vadd.f32 %v2451_v2, %v2450_v22  ;;  %v2531_v27 = vpop.f32.mrb[41].mxu1  ;;  %v3817_v29 = vadd.f32 %v2529_v20, %v1574_v4 }
 0x190   : > { %v2532_v30 = vadd.f32 %v2531_v27, %v2530_v25 }
 0x191   : > { %v1579_v12 = vadd.f32 %v2452_v26, %v3783_v28  ;;  %v2453_v31 = vpop.f32.mrb[42].mxu0 }
 0x192   : > { %v2454_v23 = vpop.f32.mrb[43].mxu0  ;;  %v2533_v46 = vpop.f32.mrb[42].mxu1 }
 0x193   : > { %v2455_v32 = vadd.f32 %v2454_v23, %v2453_v31  ;;  %v2534_v39 = vpop.f32.mrb[43].mxu1  ;;  %v3820_v48 = vadd.f32 %v2532_v30, %v1579_v12 }
 0x194   : > { %v2535_v37 = vadd.f32 %v2534_v39, %v2533_v46 }
 0x195   : > { %v1584_v21 = vadd.f32 %v2455_v32, %v3785_v33  ;;  %v2456_v61 = vpop.f32.mrb[44].mxu0 }
 0x196   : > { %v2457_v62 = vpop.f32.mrb[45].mxu0  ;;  %v2536_v17 = vpop.f32.mrb[44].mxu1 }
 0x197   : > { %v2458_v41 = vadd.f32 %v2457_v62, %v2456_v61  ;;  %v2537_v18 = vpop.f32.mrb[45].mxu1  ;;  %v3823_v35 = vadd.f32 %v2535_v37, %v1584_v21 }
 0x198   : > { %v2538_v43 = vadd.f32 %v2537_v18, %v2536_v17 }
 0x199   : > { %v1589_v28 = vadd.f32 %v2458_v41, %v3787_v40  ;;  %v2459_v44 = vpop.f32.mrb[46].mxu0 }
 0x19a   : > { %v2460_v45 = vpop.f32.mrb[47].mxu0  ;;  %v2539_v47 = vpop.f32.mrb[46].mxu1 }
 0x19b   : > { %v2461_v38 = vadd.f32 %v2460_v45, %v2459_v44  ;;  %v2540_v50 = vpop.f32.mrb[47].mxu1  ;;  %v3826_v10 = vadd.f32 %v2538_v43, %v1589_v28 }
 0x19c   : > { %v2541_v34 = vadd.f32 %v2540_v50, %v2539_v47 }
 0x19d   : > { %v1594_v33 = vadd.f32 %v2461_v38, %v3789_v42  ;;  %v2462_v51 = vpop.f32.mrb[48].mxu0 }
 0x19e   : > { %v2463_v52 = vpop.f32.mrb[49].mxu0  ;;  %v2542_v53 = vpop.f32.mrb[48].mxu1 }
 0x19f   : > { %v2464_v57 = vadd.f32 %v2463_v52, %v2462_v51  ;;  %v2543_v58 = vpop.f32.mrb[49].mxu1  ;;  %v3829_v59 = vadd.f32 %v2541_v34, %v1594_v33 }
 0x1a0   : > { %v2544_v63 = vadd.f32 %v2543_v58, %v2542_v53 }
 0x1a1   : > { %v1599_v40 = vadd.f32 %v2464_v57, %v3791_v60  ;;  %v2465_v0 = vpop.f32.mrb[50].mxu0 }
 0x1a2   : > { %v2466_v3 = vpop.f32.mrb[51].mxu0  ;;  %v2545_v6 = vpop.f32.mrb[50].mxu1 }
 0x1a3   : > { %v2467_v8 = vadd.f32 %v2466_v3, %v2465_v0  ;;  %v2546_v56 = vpop.f32.mrb[51].mxu1  ;;  %v1744_v9 = vadd.f32 %v2544_v63, %v1599_v40 }
 0x1a4   : > { %v2547_v11 = vadd.f32 %v2546_v56, %v2545_v6 }
 0x1a5   : > { %v1604_v13 = vadd.f32 %v2467_v8, %v3793_v55  ;;  %v2468_v42 = vpop.f32.mrb[52].mxu0 }
 0x1a6   : > { %v2469_v15 = vpop.f32.mrb[53].mxu0  ;;  %v2548_v16 = vpop.f32.mrb[52].mxu1 }
 0x1a7   : > { %v2470_v20 = vadd.f32 %v2469_v15, %v2468_v42  ;;  %v2549_v4 = vpop.f32.mrb[53].mxu1  ;;  %v1749_v22 = vadd.f32 %v2547_v11, %v1604_v13 }
 0x1a8   : > { %v2550_v2 = vadd.f32 %v2549_v4, %v2548_v16 }
 0x1a9   : > { %v1609_v25 = vadd.f32 %v2470_v20, %v3795_v5  ;;  %v2471_v26 = vpop.f32.mrb[54].mxu0 }
 0x1aa   : > { %v2472_v60 = vpop.f32.mrb[55].mxu0  ;;  %v2551_v27 = vpop.f32.mrb[54].mxu1 }
 0x1ab   : > { %v2473_v30 = vadd.f32 %v2472_v60, %v2471_v26  ;;  %v2552_v12 = vpop.f32.mrb[55].mxu1  ;;  %v1754_v31 = vadd.f32 %v2550_v2, %v1609_v25 }
 0x1ac   : > { %v2553_v23 = vadd.f32 %v2552_v12, %v2551_v27 }
 0x1ad   : > { %v1614_v46 = vadd.f32 %v2473_v30, %v3797_v14  ;;  %v2474_v32 = vpop.f32.mrb[56].mxu0 }
 0x1ae   : > { %v2475_v55 = vpop.f32.mrb[57].mxu0  ;;  %v2554_v39 = vpop.f32.mrb[56].mxu1 }
 0x1af   : > { %v2476_v37 = vadd.f32 %v2475_v55, %v2474_v32  ;;  %v2555_v21 = vpop.f32.mrb[57].mxu1  ;;  %v1759_v61 = vadd.f32 %v2553_v23, %v1614_v46 }
 0x1b0   : > { %v2556_v62 = vadd.f32 %v2555_v21, %v2554_v39 }
 0x1b1   : > { %v1619_v17 = vadd.f32 %v2476_v37, %v3799_v24  ;;  %v2477_v41 = vpop.f32.mrb[58].mxu0 }
 0x1b2   : > { %v2478_v5 = vpop.f32.mrb[59].mxu0  ;;  %v2557_v18 = vpop.f32.mrb[58].mxu1 }
 0x1b3   : > { %v2479_v43 = vadd.f32 %v2478_v5, %v2477_v41  ;;  %v2558_v28 = vpop.f32.mrb[59].mxu1  ;;  %v1764_v44 = vadd.f32 %v2556_v62, %v1619_v17 }
 0x1b4   : > { %v2559_v45 = vadd.f32 %v2558_v28, %v2557_v18 }
 0x1b5   : > { %v1624_v47 = vadd.f32 %v2479_v43, %v3801_v1  ;;  %v2480_v38 = vpop.f32.mrb[60].mxu0 }
 0x1b6   : > { %v2481_v14 = vpop.f32.mrb[61].mxu0  ;;  %v2560_v50 = vpop.f32.mrb[60].mxu1 }
 0x1b7   : > { %v2482_v34 = vadd.f32 %v2481_v14, %v2480_v38  ;;  %v2561_v33 = vpop.f32.mrb[61].mxu1  ;;  %v1769_v51 = vadd.f32 %v2559_v45, %v1624_v47 }
 0x1b8   : > { %v2562_v52 = vadd.f32 %v2561_v33, %v2560_v50 }
 0x1b9   : > { %v1629_v53 = vadd.f32 %v2482_v34, %v3803_v49  ;;  %v2483_v57 = vpop.f32.mrb[62].mxu0 }
 0x1ba   : > { %v2484_v24 = vpop.f32.mrb[63].mxu0  ;;  %v2563_v58 = vpop.f32.mrb[62].mxu1 }
 0x1bb   : > { %v2485_v63 = vadd.f32 %v2484_v24, %v2483_v57  ;;  %v2564_v40 = vpop.f32.mrb[63].mxu1  ;;  %v3838_v0 = vadd.f32 %v2562_v52, %v1629_v53 }
 0x1bc   : > { %v2565_v3 = vadd.f32 %v2564_v40, %v2563_v58 }
 0x1bd   : > { %v1634_v1 = vadd.f32 %v2485_v63, %v3805_v36  ;;  %v2632_v6 = vpop.f32.mrb[64].mxu0 }
 0x1be   : > { %v1854_v8 = vadd.f32 %v2632_v6, %v3811_v7  ;;  %v2644_v56 = vpop.f32.mrb[64].mxu1  ;;  %v1848_v11 = vpop.f32.mrb[65].mxu0 }
 0x1bf   : > { %v3842_v49 = vadd.f32 %v2644_v56, %v1749_v22  ;;  %v1849_v13 = vadd.f32 %v1848_v11, %v3808_v54  ;;  %v1888_v42 = vpop.f32.mrb[65].mxu1  ;;  %v1779_v15 = vadd.f32 %v2565_v3, %v1634_v1 }
 0x1c0   : > { %v1949_v16 = vmul.f32 %v1854_v8, %v1854_v8  ;;  %1989 = vst [vmem:[%s3024_s8 + $0x8] sm:$0xff] %v1854_v8  ;;  %v1889_v20 = vadd.f32 %v1888_v42, %v1744_v9 }
 0x1c1   : > { %1997 = vst [vmem:[%s3024_s8 + $0x48] sm:$0xff] %v3842_v49  ;;  %v1927_v36 = vadd.f32 %v1854_v8, %v1849_v13  ;;  %v1948_v4 = vmul.f32 %v1849_v13, %v1849_v13  ;;  %1988 = vst [vmem:[%s3024_s8] sm:$0xff] %v1849_v13  ;;  %v2635_v7 = vpop.f32.mrb[66].mxu0 }
 0x1c2   : > { %1996 = vst [vmem:[%s3024_s8 + $0x40] sm:$0xff] %v1889_v20  ;;  %v1864_v22 = vadd.f32 %v2635_v7, %v3817_v29  ;;  %v2647_v2 = vpop.f32.mrb[66].mxu1  ;;  %v1858_v54 = vpop.f32.mrb[67].mxu0  ;;  %v1956_v53 = vmul.f32 %v1889_v20, %v1889_v20 }
 0x1c3   : > { %v1964_v25 = vadd.f32 %v1949_v16, %v1948_v4  ;;  %v1904_v26 = vadd.f32 %v2647_v2, %v1759_v61  ;;  %v1859_v60 = vadd.f32 %v1858_v54, %v3814_v19  ;;  %v1898_v27 = vpop.f32.mrb[67].mxu1 }
 0x1c4   : > { %1991 = vst [vmem:[%s3024_s8 + $0x18] sm:$0xff] %v1864_v22  ;;  %v1899_v9 = vadd.f32 %v1898_v27, %v1754_v31  ;;  %v1951_v46 = vmul.f32 %v1864_v22, %v1864_v22 }
 0x1c5   : > { %1999 = vst [vmem:[%s3024_s8 + $0x58] sm:$0xff] %v1904_v26  ;;  %v1928_v30 = vadd.f32 %v1927_v36, %v1859_v60  ;;  %v1950_v12 = vmul.f32 %v1859_v60, %v1859_v60  ;;  %1990 = vst [vmem:[%s3024_s8 + $0x10] sm:$0xff] %v1859_v60  ;;  %v2638_v23 = vpop.f32.mrb[68].mxu0  ;;  %v1959_v1 = vmul.f32 %v1904_v26, %v1904_v26 }
 0x1c6   : > { %1998 = vst [vmem:[%s3024_s8 + $0x50] sm:$0xff] %v1899_v9  ;;  %v1874_v29 = vadd.f32 %v2638_v23, %v3823_v35  ;;  %v2650_v32 = vpop.f32.mrb[68].mxu1  ;;  %v1868_v55 = vpop.f32.mrb[69].mxu0  ;;  %v1958_v40 = vmul.f32 %v1899_v9, %v1899_v9 }
 0x1c7   : > { %v1965_v39 = vadd.f32 %v1964_v25, %v1950_v12  ;;  %v1914_v19 = vadd.f32 %v2650_v32, %v1769_v51  ;;  %v1869_v37 = vadd.f32 %v1868_v55, %v3820_v48  ;;  %v1929_v31 = vadd.f32 %v1928_v30, %v1864_v22  ;;  %v1908_v21 = vpop.f32.mrb[69].mxu1 }
 0x1c8   : > { %1993 = vst [vmem:[%s3024_s8 + $0x28] sm:$0xff] %v1874_v29  ;;  %v1909_v61 = vadd.f32 %v1908_v21, %v1764_v44  ;;  %v1953_v35 = vmul.f32 %v1874_v29, %v1874_v29 }
 0x1c9   : > { %2001 = vst [vmem:[%s3024_s8 + $0x68] sm:$0xff] %v1914_v19  ;;  %v1930_v62 = vadd.f32 %v1929_v31, %v1869_v37  ;;  %v1952_v17 = vmul.f32 %v1869_v37, %v1869_v37  ;;  %v1966_v41 = vadd.f32 %v1965_v39, %v1951_v46  ;;  %1992 = vst [vmem:[%s3024_s8 + $0x20] sm:$0xff] %v1869_v37  ;;  %v2641_v5 = vpop.f32.mrb[70].mxu0 }
 0x1ca   : > { %2000 = vst [vmem:[%s3024_s8 + $0x60] sm:$0xff] %v1909_v61  ;;  %v1884_v18 = vadd.f32 %v2641_v5, %v3829_v59  ;;  %v2653_v43 = vpop.f32.mrb[70].mxu1  ;;  %v1878_v48 = vpop.f32.mrb[71].mxu0  ;;  %v1960_v56 = vmul.f32 %v1909_v61, %v1909_v61  ;;  %v1961_v42 = vmul.f32 %v1914_v19, %v1914_v19 }
 0x1cb   : > { %v1967_v28 = vadd.f32 %v1966_v41, %v1952_v17  ;;  %v1924_v45 = vadd.f32 %v2653_v43, %v1779_v15  ;;  %v1879_v44 = vadd.f32 %v1878_v48, %v3826_v10  ;;  %v1931_v47 = vadd.f32 %v1930_v62, %v1874_v29  ;;  %v1918_v38 = vpop.f32.mrb[71].mxu1 }
 0x1cc   : > { %1995 = vst [vmem:[%s3024_s8 + $0x38] sm:$0xff] %v1884_v18  ;;  %v1919_v14 = vadd.f32 %v1918_v38, %v3838_v0  ;;  %v1955_v51 = vmul.f32 %v1884_v18, %v1884_v18  ;;  %v1957_v10 = vmul.f32 %v3842_v49, %v3842_v49 }
 0x1cd   : > { %2003 = vst [vmem:[%s3024_s8 + $0x78] sm:$0xff] %v1924_v45  ;;  %v1932_v50 = vadd.f32 %v1931_v47, %v1879_v44  ;;  %v1954_v34 = vmul.f32 %v1879_v44, %v1879_v44  ;;  %v1968_v33 = vadd.f32 %v1967_v28, %v1953_v35  ;;  %1994 = vst [vmem:[%s3024_s8 + $0x30] sm:$0xff] %v1879_v44 }
 0x1ce   : > { %2002 = vst [vmem:[%s3024_s8 + $0x70] sm:$0xff] %v1919_v14  ;;  %v1962_v36 = vmul.f32 %v1919_v14, %v1919_v14  ;;  %v1963_v7 = vmul.f32 %v1924_v45, %v1924_v45 }
 0x1cf   : > { %v1933_v52 = vadd.f32 %v1932_v50, %v1884_v18  ;;  %v1969_v59 = vadd.f32 %v1968_v33, %v1954_v34 }
 0x1d1   : > { %v1934_v57 = vadd.f32 %v1933_v52, %v1889_v20  ;;  %v1970_v24 = vadd.f32 %v1969_v59, %v1955_v51 }
 0x1d3   : > { %v1935_v58 = vadd.f32 %v1934_v57, %v3842_v49  ;;  %v1971_v63 = vadd.f32 %v1970_v24, %v1956_v53 }
 0x1d5   : > { %v1972_v0 = vadd.f32 %v1971_v63, %v1957_v10  ;;  %v1936_v3 = vadd.f32 %v1935_v58, %v1899_v9 }
 0x1d7   : > { %v1937_v6 = vadd.f32 %v1936_v3, %v1904_v26  ;;  %v1973_v8 = vadd.f32 %v1972_v0, %v1958_v40 }
 0x1d9   : > { %v1938_v11 = vadd.f32 %v1937_v6, %v1909_v61  ;;  %v1974_v13 = vadd.f32 %v1973_v8, %v1959_v1 }
 0x1db   : > { %v1939_v15 = vadd.f32 %v1938_v11, %v1914_v19  ;;  %v1975_v16 = vadd.f32 %v1974_v13, %v1960_v56 }
 0x1dd   : > { %v1940_v20 = vadd.f32 %v1939_v15, %v1919_v14  ;;  %v1976_v4 = vadd.f32 %v1975_v16, %v1961_v42 }
 0x1df   : > { %v1941_v22 = vadd.f32 %v1940_v20, %v1924_v45  ;;  %v1977_v2 = vadd.f32 %v1976_v4, %v1962_v36 }
 0x1e1   : > { %v1942_v49 = vrot.slane %v1941_v22, 4  ;;  %v1978_v54 = vadd.f32 %v1977_v2, %v1963_v7 }
 0x1e3   : > { %v1943_v25 = vadd.f32 %v1942_v49, %v1941_v22  ;;  %v1979_v60 = vrot.slane %v1978_v54, 4 }
 0x1e5   : > { %v1944_v27 = vrot.slane %v1943_v25, 2  ;;  %v1980_v26 = vadd.f32 %v1979_v60, %v1978_v54 }
 0x1e7   : > { %v1945_v9 = vadd.f32 %v1944_v27, %v1943_v25  ;;  %v1981_v30 = vrot.slane %v1980_v26, 2 }
 0x1e9   : > { %v1946_v12 = vrot.slane %v1945_v9, 1  ;;  %v1982_v23 = vadd.f32 %v1981_v30, %v1980_v26 }
 0x1eb   : > { %v1983_v46 = vrot.slane %v1982_v23, 1  ;;  %v1947_v29 = vadd.f32 %v1946_v12, %v1945_v9 }
 0x1ed   : > { %v1984_v32 = vadd.f32 %v1983_v46, %v1982_v23 }
 0x1ef   : > { %v1986_v55 = vsel %vm1985_vm0, %v1947_v29, %v1984_v32 }
 0x1f0   : > { %1987 = vst [vmem:[%s3107_s16] sm:$0x3] %v1986_v55 }
 0x1f1 PF: > { %s18_s28 = sadd.s32 1, %s2911_s28   ;;  %s3897_s24 = smov %s2903_s26 }
 0x1f2   : > { %p15_p1 = scmp.ge.s32.totalorder %s18_s28, 6   ;;  %s3898_s25 = smov %s2907_s27 }
 0x1f3   : > { %s3899_s26 = smov %s3902_s29  ;;  %s3900_s27 = smov %s3906_s30 }
 0x1f4   :  { %17 = sbr.rel (!%p15_p1) target bundleno = 3 (0x3), region = 112 }

</bundles_post_ra>
